<compile_context>
chip_gen: v7x
topology: tpu7x:2x2x1
jax: 0.10.0
libtpu: 0.0.40
codegen_flags: <defaults>
</compile_context>

<pallas_src>
import functools

import jax
import jax.numpy as jnp
import numpy as np
from jax.experimental import pallas as pl
from jax.experimental.pallas import tpu as pltpu

D = 32           # FLAGS.D
NUM_LAYERS = 3   # FLAGS.num_layers
HIDDEN = 64
IN_CHANNELS = 16


# ----------------------- fused forward-pass kernel ----------------------- #
def fused_net_kernel(a_ref, x_ref, w_ref, b_ref, o_ref, *,
                     num_layers, nodes_per_graph):
    """Whole Net.forward for BATCHES_PER_STEP graph-batches per grid step.

    a_ref : (1, BBN, BBN) bf16  block-diagonal A_hat of the fused batches
    x_ref : (BBN, P)      bf16  zero-padded node features (P = 128)
    w_ref : (7*P + 8, P)  bf16  packed weight slab
                                  [conv_w0 | conv_w1 | conv_w2 |
                                   w1_add | w1_max | w2 | w3 | pool one-hot]
    b_ref : (8, P)        f32   packed biases [conv_b0..2, b1, b2, b3, 0, 0]
    o_ref : (BB*G, P)     f32   lane-dense output block (column 0 = prediction)
    """
    P = x_ref.shape[-1]                   # padded feature / lane width (128)
    bbn = x_ref.shape[0]                  # node rows per grid step (BB * N)
    n_pooled = bbn // nodes_per_graph     # graphs per grid step (BB * G)

    a = a_ref[0]                          # (BBN, BBN) bf16
    h = x_ref[...]                        # (BBN, P)   bf16
    bias = b_ref[...]                     # (8, P)     f32

    # ---- GCN stack: H <- A_hat @ (H @ W) + b, ReLU except on last layer ---
    for i in range(num_layers):           # static unroll (num_layers = 3)
        w = w_ref[i * P:(i + 1) * P, :]   # (P, P) bf16 zero-padded weight
        xw = jnp.dot(h, w, preferred_element_type=jnp.float32)       # (BBN,P)
        hf = jnp.dot(a, xw.astype(jnp.bfloat16),
                     preferred_element_type=jnp.float32) + bias[i:i + 1, :]
        if i != num_layers - 1:
            hf = jnp.maximum(hf, 0.0)
        h = hf.astype(jnp.bfloat16)

    # ---- pooling over graph-contiguous, equal-size node segments ----------
    # add-pool as an MXU matmul against the packed one-hot pool matrix;
    # max-pool as a sublane-aligned segment reduce (nodes_per_graph % 8 == 0).
    pool_start = (num_layers + 4) * P
    pool = w_ref[pool_start:pool_start + n_pooled, :bbn]        # (BB*G, BBN)
    x1 = jnp.dot(pool, h, preferred_element_type=jnp.float32)   # (BB*G, P)
    x2 = jnp.max(h.reshape(n_pooled, nodes_per_graph, P), axis=1)

    # ---- MLP head: cat((x1,x2),1) @ W1 as split matmuls (no concat) -------
    w1a = w_ref[num_layers * P:(num_layers + 1) * P, :]
    w1b = w_ref[(num_layers + 1) * P:(num_layers + 2) * P, :]
    w2 = w_ref[(num_layers + 2) * P:(num_layers + 3) * P, :]
    w3 = w_ref[(num_layers + 3) * P:(num_layers + 4) * P, :]

    z = (jnp.dot(x1.astype(jnp.bfloat16), w1a,
                 preferred_element_type=jnp.float32)
         + jnp.dot(x2, w1b, preferred_element_type=jnp.float32)
         + bias[num_layers:num_layers + 1, :])
    z = jnp.maximum(z, 0.0).astype(jnp.bfloat16)
    z = (jnp.dot(z, w2, preferred_element_type=jnp.float32)
         + bias[num_layers + 1:num_layers + 2, :])
    z = jnp.maximum(z, 0.0).astype(jnp.bfloat16)
    out = (jnp.dot(z, w3, preferred_element_type=jnp.float32)
           + bias[num_layers + 2:num_layers + 3, :])
    o_ref[...] = out.astype(o_ref.dtype)           # lane-dense (BB*G, P) store


# ------------------------------- wrapper --------------------------------- #
def _pad_block(m, rows, cols, dtype):
    """Zero-pad a 2-D matrix to (rows, cols) and cast."""
    m = jnp.asarray(m)
    return jnp.zeros((rows, cols), dtype).at[:m.shape[0], :m.shape[1]].set(
        m.astype(dtype))


def net_forward(params, x, a_hat, n_graphs, nodes_per_graph, batches_per_step):
    """One fused pallas_call over B independent graph-batches.

    x:     (B, N, C_in) f32 node features
    a_hat: (B, N, N)    f32 normalized adjacency (self-loops included)
    Nodes must be graph-contiguous with equal-size graphs (standard PyG
    batching of equal-size graphs). Returns (B * n_graphs, 1) predictions.
    """
    bf16 = jnp.bfloat16
    B, N, cin = x.shape
    num_layers = len(params["conv_w"])
    d = params["conv_w"][-1].shape[1]
    bb = batches_per_step
    P = 128                                # padded feature / lane width

    assert N == n_graphs * nodes_per_graph, "graph-contiguous equal-size batching required"
    assert B % bb == 0, "B must be a multiple of batches_per_step"
    nsteps = B // bb
    bbn = bb * N                           # node rows per grid step
    n_pooled = bb * n_graphs               # pooled graphs per grid step
    assert bbn % 8 == 0 and n_pooled % 8 == 0, "blocks must stay (8,128)-aligned"
    assert nodes_per_graph % 8 == 0, "segment max needs sublane-aligned segments"
    assert cin <= P and d <= P and params["w2"].shape[0] <= P

    # block-diagonal A_hat per grid step -> every aggregation matmul has
    # 128 rows / 128-long contraction instead of 32.
    a_big = jnp.zeros((nsteps, bbn, bbn), bf16)
    a_grp = a_hat.astype(bf16).reshape(nsteps, bb, N, N)
    for b in range(bb):
        a_big = a_big.at[:, b * N:(b + 1) * N, b * N:(b + 1) * N].set(a_grp[:, b])

    # zero-padded bf16 node features, flattened to (B*N, 128)
    x_flat = _pad_block(x.reshape(B * N, cin), B * N, P, bf16)

    # single bf16 weight slab: 7 zero-padded (128,128) blocks + pool matrix
    blocks = [_pad_block(w, P, P, bf16) for w in params["conv_w"]]
    blocks += [_pad_block(params["w1"][:d], P, P, bf16),    # add-pool half of W1
               _pad_block(params["w1"][d:], P, P, bf16),    # max-pool half of W1
               _pad_block(params["w2"], P, P, bf16),
               _pad_block(params["w3"], P, P, bf16)]
    pool = jnp.zeros((n_pooled, bbn), jnp.float32)
    for b in range(bb):
        for g in range(n_graphs):
            r = b * n_graphs + g
            c0 = b * N + g * nodes_per_graph
            pool = pool.at[r, c0:c0 + nodes_per_graph].set(1.0)
    pool_rows = ((n_pooled + 7) // 8) * 8
    blocks.append(_pad_block(pool, pool_rows, P, bf16))
    wslab = jnp.concatenate(blocks, axis=0)                 # ((L+4)*128+8, 128)

    # single f32 bias slab
    bslab = jnp.zeros((8, P), jnp.float32)
    for i, cb in enumerate(params["conv_b"]):
        bslab = bslab.at[i, :cb.shape[0]].set(cb)
    bslab = bslab.at[num_layers, :params["b1"].shape[0]].set(params["b1"])
    bslab = bslab.at[num_layers + 1, :params["b2"].shape[0]].set(params["b2"])
    bslab = bslab.at[num_layers + 2, :params["b3"].shape[0]].set(params["b3"])

    kernel = functools.partial(fused_net_kernel,
                               num_layers=num_layers,
                               nodes_per_graph=nodes_per_graph)
    out = pl.pallas_call(
        kernel,
        out_shape=jax.ShapeDtypeStruct((nsteps * n_pooled, P), jnp.float32),
        grid=(nsteps,),
        in_specs=[
            pl.BlockSpec((1, bbn, bbn), lambda s: (s, 0, 0)),   # block-diag A_hat
            pl.BlockSpec((bbn, P), lambda s: (s, 0)),           # node features
            pl.BlockSpec(wslab.shape, lambda s: (0, 0)),        # weight slab (resident)
            pl.BlockSpec(bslab.shape, lambda s: (0, 0)),        # bias slab (resident)
        ],
        out_specs=pl.BlockSpec((n_pooled, P), lambda s: (s, 0)),
        compiler_params=pltpu.CompilerParams(
            dimension_semantics=("parallel",)),                 # both v7x TCs
    )(a_big, x_flat, wslab, bslab)

    return out[:, :1]                       # (B * n_graphs, 1), column 0 valid


# ------------------------------ references ------------------------------- #
def net_forward_ref_f32(params, x, a_hat, seg):
    """Pure-JAX, full-f32, general (one-hot batch) reference semantics."""
    B = x.shape[0]
    h = x
    n_layers = len(params["conv_w"])
    for i in range(n_layers):
        xw = jnp.einsum("bnc,cd->bnd", h, params["conv_w"][i])
        h = jnp.einsum("bnm,bmd->bnd", a_hat, xw) + params["conv_b"][i]
        if i != n_layers - 1:
            h = jnp.maximum(h, 0.0)
    x1 = jnp.einsum("bgn,bnd->bgd", seg, h)
    masked = jnp.where(seg[:, :, :, None] > 0.5, h[:, None, :, :], -1e30)
    x2 = jnp.max(masked, axis=2)
    cat = jnp.concatenate([x1, x2], axis=-1)
    z = jnp.maximum(cat @ params["w1"] + params["b1"], 0.0)
    z = jnp.maximum(z @ params["w2"] + params["b2"], 0.0)
    out = z @ params["w3"] + params["b3"]
    return out.reshape(B * seg.shape[1], 1)


def net_forward_ref_matched(params, x, a_hat, n_graphs, nodes_per_graph):
    """Pure-JAX path with the SAME numerics as the kernel (bf16 operands,
    f32 accumulation, contiguous-segment pooling, split W1)."""
    bf16 = jnp.bfloat16
    B, N, _ = x.shape
    a = a_hat.astype(bf16)
    h = x.astype(bf16)
    n_layers = len(params["conv_w"])
    for i in range(n_layers):
        w = params["conv_w"][i].astype(bf16)
        xw = jnp.einsum("bnc,cd->bnd", h, w, preferred_element_type=jnp.float32)
        hf = jnp.einsum("bnm,bmd->bnd", a, xw.astype(bf16),
                        preferred_element_type=jnp.float32) + params["conv_b"][i]
        if i != n_layers - 1:
            hf = jnp.maximum(hf, 0.0)
        h = hf.astype(bf16)
    d = params["conv_w"][-1].shape[1]
    hg = h.reshape(B, n_graphs, nodes_per_graph, d)
    x1 = hg.astype(jnp.float32).sum(axis=2)          # add-pool (f32 acc)
    x2 = hg.max(axis=2)                              # max-pool (bf16)
    w1a = params["w1"][:d].astype(bf16)
    w1b = params["w1"][d:].astype(bf16)
    z = (jnp.einsum("bgd,dh->bgh", x1.astype(bf16), w1a,
                    preferred_element_type=jnp.float32)
         + jnp.einsum("bgd,dh->bgh", x2, w1b,
                      preferred_element_type=jnp.float32)
         + params["b1"])
    z = jnp.maximum(z, 0.0).astype(bf16)
    z = jnp.einsum("bgh,hk->bgk", z, params["w2"].astype(bf16),
                   preferred_element_type=jnp.float32) + params["b2"]
    z = jnp.maximum(z, 0.0).astype(bf16)
    out = jnp.einsum("bgh,hk->bgk", z, params["w3"].astype(bf16),
                     preferred_element_type=jnp.float32) + params["b3"]
    return out.reshape(B * n_graphs, 1)


# ----------------------------- param / data ------------------------------ #
def init_params(key, in_channels, d, num_layers, hidden):
    keys = jax.random.split(key, 2 * num_layers + 6)
    conv_w, conv_b = [], []
    fan_in = in_channels
    for i in range(num_layers):
        scale = 1.0 / np.sqrt(fan_in)
        conv_w.append(jax.random.uniform(keys[2 * i], (fan_in, d),
                                         minval=-scale, maxval=scale,
                                         dtype=jnp.float32))
        conv_b.append(jax.random.uniform(keys[2 * i + 1], (d,),
                                         minval=-scale, maxval=scale,
                                         dtype=jnp.float32))
        fan_in = d
    k = 2 * num_layers

    def lin(k_w, k_b, fin, fout):
        s = 1.0 / np.sqrt(fin)
        w = jax.random.uniform(k_w, (fin, fout), minval=-s, maxval=s,
                               dtype=jnp.float32)
        b = jax.random.uniform(k_b, (fout,), minval=-s, maxval=s,
                               dtype=jnp.float32)
        return w, b

    w1, b1 = lin(keys[k], keys[k + 1], 2 * d, hidden)
    w2, b2 = lin(keys[k + 2], keys[k + 3], hidden, hidden)
    w3, b3 = lin(keys[k + 4], keys[k + 5], hidden, 1)
    return dict(conv_w=conv_w, conv_b=conv_b,
                w1=w1, b1=b1, w2=w2, b2=b2, w3=w3, b3=b3)


def build_graphs(key, n_batches, n_nodes, n_graphs, in_channels):
    """B independent graph-batches: ring graphs + varying chords.
    Returns x (B,N,C), dense normalized A_hat (B,N,N), seg one-hot (B,G,N)."""
    per = n_nodes // n_graphs
    a_hats = np.zeros((n_batches, n_nodes, n_nodes), np.float32)
    seg = np.zeros((n_batches, n_graphs, n_nodes), np.float32)
    for b in range(n_batches):
        adj = np.zeros((n_nodes, n_nodes), np.float32)
        for g in range(n_graphs):
            base = g * per
            seg[b, g, base:base + per] = 1.0
            for i in range(per):
                u, v = base + i, base + (i + 1) % per
                adj[u, v] = adj[v, u] = 1.0
            off = 2 + (b + g) % (per - 3)          # batch/graph-dependent chord
            adj[base, base + off] = adj[base + off, base] = 1.0
        a_t = adj + np.eye(n_nodes, dtype=np.float32)
        dinv = 1.0 / np.sqrt(a_t.sum(axis=1))
        a_hats[b] = dinv[:, None] * a_t * dinv[None, :]
    x = jax.random.normal(key, (n_batches, n_nodes, in_channels), jnp.float32)
    return x, jnp.asarray(a_hats), jnp.asarray(seg)


# TODO(synk): dropout is defined in __init__ but never applied in forward(),
# and the bns (BatchNorm1d) list is likewise unused in forward(); both omitted.

if __name__ == "__main__":
    N_BATCHES = 8                 # independent PyG-style graph-batches per call
    N_NODES = 32                  # nodes per graph-batch
    N_GRAPHS = 2                  # graphs per batch
    PER_GRAPH = N_NODES // N_GRAPHS
    BATCHES_PER_STEP = 4          # -> 128 node rows per grid step, grid=(2,)

    key = jax.random.PRNGKey(0)
    k_param, k_x = jax.random.split(key)

    params = init_params(k_param, IN_CHANNELS, D, NUM_LAYERS, HIDDEN)
    x, a_hat, seg = build_graphs(k_x, N_BATCHES, N_NODES, N_GRAPHS, IN_CHANNELS)

    out = jax.block_until_ready(
        net_forward(params, x, a_hat, N_GRAPHS, PER_GRAPH, BATCHES_PER_STEP))
    assert out.shape == (N_BATCHES * N_GRAPHS, 1), out.shape

    # Tight check vs. a pure-JAX path with identical numerics
    # (bf16 operands, f32 accumulation, segment pooling, split W1).
    ref_matched = net_forward_ref_matched(params, x, a_hat, N_GRAPHS, PER_GRAPH)
    np.testing.assert_allclose(np.asarray(out), np.asarray(ref_matched),
                               rtol=2e-3, atol=2e-3)

    # Looser sanity check vs. the full-f32 general (one-hot batch) reference:
    # bf16 operands keep the output within a few percent of the f32 model.
    ref_f32 = net_forward_ref_f32(params, x, a_hat, seg)
    np.testing.assert_allclose(np.asarray(out), np.asarray(ref_f32),
                               rtol=5e-2, atol=5e-2)

    print("KERNEL_OK")
</pallas_src>

<mosaic_0001>
module attributes {stable_mosaic.version = 11 : i64} {
  func.func @fused_net_kernel(%arg0: i32, %arg1: memref<1x128x128xbf16, #tpu.memory_space<vmem>>, %arg2: memref<128x128xbf16, #tpu.memory_space<vmem>>, %arg3: memref<904x128xbf16, #tpu.memory_space<vmem>>, %arg4: memref<8x128xf32, #tpu.memory_space<vmem>>, %arg5: memref<8x128xf32, #tpu.memory_space<vmem>>) attributes {dimension_semantics = [#tpu.dimension_semantics<parallel>], iteration_bounds = array<i64: 2>, scalar_prefetch = 0 : i64, scratch_operands = 0 : i64, tpu.core_type = #tpu.core_type<tc>, window_params = [{transform_indices = @transform_0, window_bounds = array<i64: 1, 128, 128>}, {transform_indices = @transform_1, window_bounds = array<i64: 128, 128>}, {pipeline_mode = #tpu.pipeline_mode<synchronous>, transform_indices = @transform_2, window_bounds = array<i64: 904, 128>}, {pipeline_mode = #tpu.pipeline_mode<synchronous>, transform_indices = @transform_3, window_bounds = array<i64: 8, 128>}, {transform_indices = @transform_4, window_bounds = array<i64: 8, 128>}]} {
    %c0 = arith.constant 0 : index
    %c0_0 = arith.constant 0 : index
    %c0_1 = arith.constant 0 : index
    %0 = vector.load %arg1[%c0, %c0_0, %c0_1] : memref<1x128x128xbf16, #tpu.memory_space<vmem>>, vector<1x128x128xbf16>
    %1 = vector.shape_cast %0 : vector<1x128x128xbf16> to vector<128x128xbf16>
    %c0_2 = arith.constant 0 : index
    %c0_3 = arith.constant 0 : index
    %2 = vector.load %arg2[%c0_2, %c0_3] : memref<128x128xbf16, #tpu.memory_space<vmem>>, vector<128x128xbf16>
    %c0_4 = arith.constant 0 : index
    %c0_5 = arith.constant 0 : index
    %3 = vector.load %arg4[%c0_4, %c0_5] : memref<8x128xf32, #tpu.memory_space<vmem>>, vector<8x128xf32>
    %c0_6 = arith.constant 0 : index
    %c0_7 = arith.constant 0 : index
    %4 = vector.load %arg3[%c0_6, %c0_7] : memref<904x128xbf16, #tpu.memory_space<vmem>>, vector<128x128xbf16>
    %cst = arith.constant dense<0.000000e+00> : vector<128x128xf32>
    %5 = tpu.matmul %2, %4, %cst {dimension_numbers = #tpu.dot_dimension_numbers<[1], [0], [0], [1], [0, 0, 1, 1], [], []>} : vector<128x128xbf16>, vector<128x128xbf16>, vector<128x128xf32> -> vector<128x128xf32>
    %6 = arith.truncf %5 : vector<128x128xf32> to vector<128x128xbf16>
    %cst_8 = arith.constant dense<0.000000e+00> : vector<128x128xf32>
    %7 = tpu.matmul %1, %6, %cst_8 {dimension_numbers = #tpu.dot_dimension_numbers<[1], [0], [0], [1], [0, 0, 1, 1], [], []>} : vector<128x128xbf16>, vector<128x128xbf16>, vector<128x128xf32> -> vector<128x128xf32>
    %8 = vector.extract_strided_slice %3 {offsets = [0, 0], sizes = [1, 128], strides = [1, 1]} : vector<8x128xf32> to vector<1x128xf32>
    %9 = vector.broadcast %8 : vector<1x128xf32> to vector<128x128xf32>
    %10 = arith.addf %7, %9 : vector<128x128xf32>
    %cst_9 = arith.constant 0.000000e+00 : f32
    %11 = vector.broadcast %cst_9 : f32 to vector<128x128xf32>
    %12 = arith.maximumf %10, %11 : vector<128x128xf32>
    %13 = arith.truncf %12 : vector<128x128xf32> to vector<128x128xbf16>
    %c128 = arith.constant 128 : index
    %c0_10 = arith.constant 0 : index
    %14 = vector.load %arg3[%c128, %c0_10] : memref<904x128xbf16, #tpu.memory_space<vmem>>, vector<128x128xbf16>
    %cst_11 = arith.constant dense<0.000000e+00> : vector<128x128xf32>
    %15 = tpu.matmul %13, %14, %cst_11 {dimension_numbers = #tpu.dot_dimension_numbers<[1], [0], [0], [1], [0, 0, 1, 1], [], []>} : vector<128x128xbf16>, vector<128x128xbf16>, vector<128x128xf32> -> vector<128x128xf32>
    %16 = arith.truncf %15 : vector<128x128xf32> to vector<128x128xbf16>
    %cst_12 = arith.constant dense<0.000000e+00> : vector<128x128xf32>
    %17 = tpu.matmul %1, %16, %cst_12 {dimension_numbers = #tpu.dot_dimension_numbers<[1], [0], [0], [1], [0, 0, 1, 1], [], []>} : vector<128x128xbf16>, vector<128x128xbf16>, vector<128x128xf32> -> vector<128x128xf32>
    %18 = vector.extract_strided_slice %3 {offsets = [1, 0], sizes = [1, 128], strides = [1, 1]} : vector<8x128xf32> to vector<1x128xf32>
    %19 = vector.broadcast %18 : vector<1x128xf32> to vector<128x128xf32>
    %20 = arith.addf %17, %19 : vector<128x128xf32>
    %cst_13 = arith.constant 0.000000e+00 : f32
    %21 = vector.broadcast %cst_13 : f32 to vector<128x128xf32>
    %22 = arith.maximumf %20, %21 : vector<128x128xf32>
    %23 = arith.truncf %22 : vector<128x128xf32> to vector<128x128xbf16>
    %c256 = arith.constant 256 : index
    %c0_14 = arith.constant 0 : index
    %24 = vector.load %arg3[%c256, %c0_14] : memref<904x128xbf16, #tpu.memory_space<vmem>>, vector<128x128xbf16>
    %cst_15 = arith.constant dense<0.000000e+00> : vector<128x128xf32>
    %25 = tpu.matmul %23, %24, %cst_15 {dimension_numbers = #tpu.dot_dimension_numbers<[1], [0], [0], [1], [0, 0, 1, 1], [], []>} : vector<128x128xbf16>, vector<128x128xbf16>, vector<128x128xf32> -> vector<128x128xf32>
    %26 = arith.truncf %25 : vector<128x128xf32> to vector<128x128xbf16>
    %cst_16 = arith.constant dense<0.000000e+00> : vector<128x128xf32>
    %27 = tpu.matmul %1, %26, %cst_16 {dimension_numbers = #tpu.dot_dimension_numbers<[1], [0], [0], [1], [0, 0, 1, 1], [], []>} : vector<128x128xbf16>, vector<128x128xbf16>, vector<128x128xf32> -> vector<128x128xf32>
    %28 = vector.extract_strided_slice %3 {offsets = [2, 0], sizes = [1, 128], strides = [1, 1]} : vector<8x128xf32> to vector<1x128xf32>
    %29 = vector.broadcast %28 : vector<1x128xf32> to vector<128x128xf32>
    %30 = arith.addf %27, %29 : vector<128x128xf32>
    %31 = arith.truncf %30 : vector<128x128xf32> to vector<128x128xbf16>
    %c896 = arith.constant 896 : index
    %c0_17 = arith.constant 0 : index
    %32 = vector.load %arg3[%c896, %c0_17] : memref<904x128xbf16, #tpu.memory_space<vmem>>, vector<8x128xbf16>
    %cst_18 = arith.constant dense<0.000000e+00> : vector<8x128xf32>
    %33 = tpu.matmul %32, %31, %cst_18 {dimension_numbers = #tpu.dot_dimension_numbers<[1], [0], [0], [1], [0, 0, 1, 1], [], []>} : vector<8x128xbf16>, vector<128x128xbf16>, vector<8x128xf32> -> vector<8x128xf32>
    %34 = vector.shape_cast %31 : vector<128x128xbf16> to vector<8x16x128xbf16>
    %cst_19 = arith.constant dense<0xFF80> : vector<8x128xbf16>
    %35 = vector.multi_reduction <maximumf>, %34, %cst_19 [1] : vector<8x16x128xbf16> to vector<8x128xbf16>
    %c384 = arith.constant 384 : index
    %c0_20 = arith.constant 0 : index
    %36 = vector.load %arg3[%c384, %c0_20] : memref<904x128xbf16, #tpu.memory_space<vmem>>, vector<128x128xbf16>
    %c512 = arith.constant 512 : index
    %c0_21 = arith.constant 0 : index
    %37 = vector.load %arg3[%c512, %c0_21] : memref<904x128xbf16, #tpu.memory_space<vmem>>, vector<128x128xbf16>
    %c640 = arith.constant 640 : index
    %c0_22 = arith.constant 0 : index
    %38 = vector.load %arg3[%c640, %c0_22] : memref<904x128xbf16, #tpu.memory_space<vmem>>, vector<128x128xbf16>
    %c768 = arith.constant 768 : index
    %c0_23 = arith.constant 0 : index
    %39 = vector.load %arg3[%c768, %c0_23] : memref<904x128xbf16, #tpu.memory_space<vmem>>, vector<128x128xbf16>
    %40 = arith.truncf %33 : vector<8x128xf32> to vector<8x128xbf16>
    %cst_24 = arith.constant dense<0.000000e+00> : vector<8x128xf32>
    %41 = tpu.matmul %40, %36, %cst_24 {dimension_numbers = #tpu.dot_dimension_numbers<[1], [0], [0], [1], [0, 0, 1, 1], [], []>} : vector<8x128xbf16>, vector<128x128xbf16>, vector<8x128xf32> -> vector<8x128xf32>
    %cst_25 = arith.constant dense<0.000000e+00> : vector<8x128xf32>
    %42 = tpu.matmul %35, %37, %cst_25 {dimension_numbers = #tpu.dot_dimension_numbers<[1], [0], [0], [1], [0, 0, 1, 1], [], []>} : vector<8x128xbf16>, vector<128x128xbf16>, vector<8x128xf32> -> vector<8x128xf32>
    %43 = arith.addf %41, %42 : vector<8x128xf32>
    %44 = vector.extract_strided_slice %3 {offsets = [3, 0], sizes = [1, 128], strides = [1, 1]} : vector<8x128xf32> to vector<1x128xf32>
    %45 = vector.broadcast %44 : vector<1x128xf32> to vector<8x128xf32>
    %46 = arith.addf %43, %45 : vector<8x128xf32>
    %cst_26 = arith.constant 0.000000e+00 : f32
    %47 = vector.broadcast %cst_26 : f32 to vector<8x128xf32>
    %48 = arith.maximumf %46, %47 : vector<8x128xf32>
    %49 = arith.truncf %48 : vector<8x128xf32> to vector<8x128xbf16>
    %cst_27 = arith.constant dense<0.000000e+00> : vector<8x128xf32>
    %50 = tpu.matmul %49, %38, %cst_27 {dimension_numbers = #tpu.dot_dimension_numbers<[1], [0], [0], [1], [0, 0, 1, 1], [], []>} : vector<8x128xbf16>, vector<128x128xbf16>, vector<8x128xf32> -> vector<8x128xf32>
    %51 = vector.extract_strided_slice %3 {offsets = [4, 0], sizes = [1, 128], strides = [1, 1]} : vector<8x128xf32> to vector<1x128xf32>
    %52 = vector.broadcast %51 : vector<1x128xf32> to vector<8x128xf32>
    %53 = arith.addf %50, %52 : vector<8x128xf32>
    %cst_28 = arith.constant 0.000000e+00 : f32
    %54 = vector.broadcast %cst_28 : f32 to vector<8x128xf32>
    %55 = arith.maximumf %53, %54 : vector<8x128xf32>
    %56 = arith.truncf %55 : vector<8x128xf32> to vector<8x128xbf16>
    %cst_29 = arith.constant dense<0.000000e+00> : vector<8x128xf32>
    %57 = tpu.matmul %56, %39, %cst_29 {dimension_numbers = #tpu.dot_dimension_numbers<[1], [0], [0], [1], [0, 0, 1, 1], [], []>} : vector<8x128xbf16>, vector<128x128xbf16>, vector<8x128xf32> -> vector<8x128xf32>
    %58 = vector.extract_strided_slice %3 {offsets = [5, 0], sizes = [1, 128], strides = [1, 1]} : vector<8x128xf32> to vector<1x128xf32>
    %59 = vector.broadcast %58 : vector<1x128xf32> to vector<8x128xf32>
    %60 = arith.addf %57, %59 : vector<8x128xf32>
    %c0_30 = arith.constant 0 : index
    %c0_31 = arith.constant 0 : index
    %61 = vector.load %arg5[%c0_30, %c0_31] : memref<8x128xf32, #tpu.memory_space<vmem>>, vector<8x128xf32>
    tpu.vector_store %arg5[%c0_30, %c0_31], %60 {strides = array<i32>} : memref<8x128xf32, #tpu.memory_space<vmem>>, vector<8x128xf32>,
    return
  }
  func.func @transform_0(%arg0: i32) -> (i32, i32, i32) {
    %c0_i32 = arith.constant 0 : i32
    %c0_i32_0 = arith.constant 0 : i32
    %c0_i32_1 = arith.constant 0 : i32
    return %arg0, %c0_i32, %c0_i32_0 : i32, i32, i32
  }
  func.func @transform_1(%arg0: i32) -> (i32, i32) {
    %c0_i32 = arith.constant 0 : i32
    %c0_i32_0 = arith.constant 0 : i32
    return %arg0, %c0_i32 : i32, i32
  }
  func.func @transform_2(%arg0: i32) -> (i32, i32) {
    %c0_i32 = arith.constant 0 : i32
    %c0_i32_0 = arith.constant 0 : i32
    %c0_i32_1 = arith.constant 0 : i32
    return %c0_i32, %c0_i32_0 : i32, i32
  }
  func.func @transform_3(%arg0: i32) -> (i32, i32) {
    %c0_i32 = arith.constant 0 : i32
    %c0_i32_0 = arith.constant 0 : i32
    %c0_i32_1 = arith.constant 0 : i32
    return %c0_i32, %c0_i32_0 : i32, i32
  }
  func.func @transform_4(%arg0: i32) -> (i32, i32) {
    %c0_i32 = arith.constant 0 : i32
    %c0_i32_0 = arith.constant 0 : i32
    return %arg0, %c0_i32 : i32, i32
  }
}

</mosaic_0001>

<bundles_post_ra>
// kernel: tpu_custom_call.1
= control target key start
LH: loop header
LB: loop body
LE: loop exit
PB: predicated region body
PF: predicated region fallthrough
CT: control target
= control target key end

     0   :  { %s3232_s0 = inlined_call_operand.hbm [shape: bf16[2,128,128], index: 0, kind: input, shape index: {}]   ;;  %s3233_s1 = inlined_call_operand.hbm [shape: bf16[256,128], index: 1, kind: input, shape index: {}]   ;;  %s3234_s2 = inlined_call_operand.hbm [shape: bf16[904,128], index: 2, kind: input, shape index: {}]   ;;  %s3235_s3 = inlined_call_operand.vmem [shape: f32[8,128], index: 3, kind: input, shape index: {}]   ;;  %s3236_s4 = inlined_call_operand.hbm [shape: f32[16,128], index: 4, kind: output, shape index: {}]  }
   0x1   :  { %3244 = sst [smem:[#allocation14_spill]] %s3232_s0 }
   0x2   :  { %3245 = sst [smem:[#allocation15_spill]] %s3234_s2 }
   0x3   :  { %9 = vsyncpa [#allocation3], 0 }
   0x4   :  { %11 = vsyncpa [#allocation3 + $0x1], 0 }
   0x5   :  { %12 = vsyncpa [#allocation6], 0 }
   0x6   :  { %14 = vsyncpa [#allocation6 + $0x1], 0 }
   0x7   :  { %15 = vsyncpa [#allocation4], 0 }
   0x8   :  { %17 = vsyncpa [#allocation4 + $0x1], 0  ;;  %s2833_s15 = smov 0   ;;  %s2835_s16 = smov 0  }
   0x9   :  { %s2837_s17 = smov 0   ;;  %s2839_s18 = smov 0  }
   0xa LB: > { %s2854_s19 = sadd.s32 4294967295, %s2798_s18   ;;  %s1971_s20 = sadd.s32 4294967294, %s2798_s18   ;;  %s2798_s18 = sphi %s2839_s18, %s3268_s18   ;;  %s2794_s17 = sphi %s2837_s17, %s3267_s17   ;;  %s2790_s16 = sphi %s2835_s16, %s3266_s16   ;;  %s2786_s15 = sphi %s2833_s15, %s3265_s15  }
   0xb   : > { %p43_p0 = scmp.ne.s32.totalorder %s2790_s16, %s2786_s15  ;;  %p3237_p1 = scmp.eq.s32.totalorder %s2854_s19, 0 }
   0xc   : > { %p141_p3 = scmp.eq.s32.totalorder %s1971_s20, 1  ;;  %p1972_p5 = scmp.ge.s32.totalorder %s2798_s18, 1 }
   0xd   : > { %p2863_p4 = por %p3237_p1, %p43_p0  ;;  %p148_p7 = scmp.lt.s32.totalorder %s2798_s18, 3 }
   0xe   : > { %p2868_p6 = por %p141_p3, %p43_p0  ;;  %s2800_s24 = smov [#allocation7]  }
   0xf   : > { %s3246_s21 = scalar_select %p2863_p4, 1, 0 }
  0x10   : > { %s3247_s22 = scalar_select %p2868_p6, 1, 0 }
  0x11   : > { %p2873_p8 = pnand %p1972_p5, %p148_p7  ;;  %s160_s25 = sshll.u32 %s2800_s24, 4  ;;  %s2877_s25 = int_to_ptr.vmem [resolvable:$true] %s160_s25 }
  0x12   : > { %s2889_s27 = sadd.s32 1, %s2798_s18   ;;  %s30_s28 = sadd.s32 1, %s2794_s17 }
  0x13   : > { %s3248_s23 = scalar_select %p2873_p8, 1, 0 }
  0x14   : > { %p2507_p9 = pneg %p2873_p8  ;;  %s27_s29 = ssub.s32 %s2798_s18, %s2889_s27 }
  0x15   : > { %s3250_s2 = sld [smem:[#allocation15_spill]] }
  0x16   : > { %p2884_p11 = pnand %p2507_p9, %p3237_p1 }
  0x18   : > { %p2638_p13 = pneg %p2884_p11 }
  0x1b   : > { %s2636_s6 = scalar_lea.hbm %s3250_s2, 7232 }
  0x1c   : > { %p2637_p12 = scmp.ne.s32.totalorder %s3250_s2, %s2636_s6  ;;  %p2643_p5 = scmp.lt.u32.totalorder %s2636_s6, %s3250_s2 }
  0x1e   : > { %p2639_p0 = pnand %p2638_p13, %p2637_p12 }
  0x20   : > { %p2640_p3 = pneg %p2639_p0 }
  0x22   : > { %p2645_p7 = pnand %p2643_p5, %p2640_p3 }
  0x24   : > { %2648 = shalt.err (!%p2645_p7)
}
  0x25   : > { %s2649_s11 = scalar_lea.vmem %s2877_s25, 7232  ;;  %p2657_p2 = scmp.lt.s32.totalorder %s2877_s25, %s2877_s25 }
  0x26   : > { %p2650_p9 = scmp.ne.s32.totalorder %s2877_s25, %s2649_s11  ;;  %p2658_p6 = scmp.lt.s32.totalorder %s2649_s11, %s2649_s11 }
  0x28   : > { %p2652_p10 = pnand %p2650_p9, %p2638_p13  ;;  %p2659_p4 = por %p2658_p6, %p2657_p2 }
  0x2a   : > { %p2653_p1 = pneg %p2652_p10 }
  0x2c   : > { %p2660_p8 = pnand %p2659_p4, %p2653_p1 }
  0x2e   : > { %2663 = shalt.err (!%p2660_p8)
}
  0x2f   : > { %s3240_s12 = smov 64   ;;  %s3242_s13 = smov 4  }
  0x30   : > { %2510 = dma.hbm_to_vmem [thread:$0]  (!%p2884_p11), %s3250_s2, 7232, %s2877_s25, [#allocation6], %s3240_s12, %s3240_s12, %s3242_s13  }
  0x31   : > { %p28_p1 = scmp.eq.s32.totalorder %s27_s29, 0  ;;  %p37_p2 = scmp.ne.s32.totalorder %s2794_s17, %s2790_s16 }
  0x32   : > { %p38_p4 = scmp.eq.s32.totalorder %s2798_s18, 0  ;;  %p2523_p6 = scmp.lt.s32.totalorder %s2798_s18, 2 }
  0x33   : > { %s2923_s24 = scalar_select %p28_p1, %s2794_s17, %s30_s28  }
  0x34   : > { %p39_p8 = por %p38_p4, %p37_p2  ;;  %p3252_p10 = scmp.eq.s32.totalorder %s2854_s19, 1 }
  0x35   : > { %3251 = sst [smem:[#allocation13_spill]] %s2923_s24  ;;  %s177_s26 = sand.u32 1, %s2794_s17  }
  0x36   : > { %p2927_p12 = por %p3252_p10, %p37_p2  ;;  %s2062_s5 = sshll.u32 %s2798_s18, 10 }
  0x37   : > { %s2933_s6 = sshll.u32 %s177_s26, 6  ;;  %s3254_s0 = sld [smem:[#allocation14_spill]] }
  0x38   : > { %s181_s28 = scalar_lea.vmem [#allocation2], %s2933_s6  ;;  %p2941_p11 = pnand %p2523_p6, %p39_p8 }
  0x39   : > { %s188_s29 = sshll.u32 %s181_s28, 4  ;;  %s2950_s14 = scalar_lea.hbm %s3233_s1, %s2062_s5  ;;  %s2945_s29 = int_to_ptr.vmem [resolvable:$true] %s188_s29 }
  0x3a   : > { %s2952_s20 = scalar_lea.sflag [#allocation3], %s177_s26  ;;  %p2666_p0 = pneg %p2941_p11 }
  0x3d   : > { %s2938_s25 = scalar_lea.hbm %s3254_s0, %s2062_s5  ;;  %s2669_s12 = scalar_lea.hbm %s3254_s0, 2048 }
  0x3e   : > { %s2664_s7 = scalar_lea.hbm %s2938_s25, 1024  ;;  %p2670_p7 = scmp.lt.u32.totalorder %s2938_s25, %s3254_s0 }
  0x3f   : > { %p2665_p13 = scmp.ne.s32.totalorder %s2938_s25, %s2664_s7  ;;  %p2671_p9 = scmp.lt.u32.totalorder %s2669_s12, %s2664_s7 }
  0x40   : > { %p2673_p2 = scmp.lt.u32.totalorder %s2664_s7, %s2938_s25 }
  0x41   : > { %p2667_p3 = pnand %p2666_p0, %p2665_p13  ;;  %p2672_p1 = por %p2671_p9, %p2670_p7 }
  0x43   : > { %p2668_p5 = pneg %p2667_p3  ;;  %p2674_p4 = por %p2673_p2, %p2672_p1 }
  0x45   : > { %p2675_p6 = pnand %p2674_p4, %p2668_p5 }
  0x47   : > { %2678 = shalt.err (!%p2675_p6)
}
  0x48   : > { %s2679_s26 = scalar_lea.vmem %s2945_s29, 1024  ;;  %s2803_s5 = smov [#allocation2]  }
  0x49   : > { %p2680_p8 = scmp.ne.s32.totalorder %s2945_s29, %s2679_s26  ;;  %s2684_s10 = sshll.u32 %s2803_s5, 4  ;;  %s2685_s10 = int_to_ptr.vmem [resolvable:$false] %s2684_s10 }
  0x4a   : > { %s2686_s2 = scalar_lea.vmem %s2685_s10, 2048  ;;  %p2687_p3 = scmp.lt.s32.totalorder %s2945_s29, %s2685_s10 }
  0x4b   : > { %p2682_p10 = pnand %p2680_p8, %p2666_p0  ;;  %p2688_p7 = scmp.lt.s32.totalorder %s2686_s2, %s2679_s26 }
  0x4d   : > { %p2683_p13 = pneg %p2682_p10  ;;  %p2689_p9 = por %p2688_p7, %p2687_p3 }
  0x4f   : > { %p2690_p1 = pnand %p2689_p9, %p2683_p13 }
  0x51   : > { %2693 = shalt.err (!%p2690_p1)
}
  0x52   : > { %s3256_s12 = smov 4   ;;  %s3257_s13 = smov 64  }
  0x53   : > { %2514 = dma.hbm_to_vmem [thread:$0]  (!%p2941_p11), %s2938_s25, 1024, %s2945_s29, %s2952_s20, %s3257_s13, %s3257_s13, %s3256_s12  }
  0x54   : > { %s202_s11 = scalar_lea.vmem [#allocation5], %s2933_s6  ;;  %s198_s8 = sand.u32 1, %s2798_s18  }
  0x55   : > { %s209_s7 = sshll.u32 %s202_s11, 4  ;;  %s2987_s28 = scalar_lea.sflag [#allocation6], %s198_s8  ;;  %s2985_s7 = int_to_ptr.vmem [resolvable:$true] %s209_s7 }
  0x56   : > { %s2694_s26 = scalar_lea.hbm %s2950_s14, 1024  ;;  %s2699_s2 = scalar_lea.hbm %s3233_s1, 2048 }
  0x57   : > { %p2695_p5 = scmp.ne.s32.totalorder %s2950_s14, %s2694_s26  ;;  %p2700_p6 = scmp.lt.u32.totalorder %s2950_s14, %s3233_s1 }
  0x58   : > { %p2701_p8 = scmp.lt.u32.totalorder %s2699_s2, %s2694_s26  ;;  %p2703_p13 = scmp.lt.u32.totalorder %s2694_s26, %s2950_s14 }
  0x59   : > { %p2697_p2 = pnand %p2695_p5, %p2666_p0 }
  0x5a   : > { %p2702_p10 = por %p2701_p8, %p2700_p6 }
  0x5b   : > { %p2698_p4 = pneg %p2697_p2 }
  0x5c   : > { %p2704_p3 = por %p2703_p13, %p2702_p10 }
  0x5e   : > { %p2705_p7 = pnand %p2704_p3, %p2698_p4 }
  0x60   : > { %2708 = shalt.err (!%p2705_p7)
}
  0x61   : > { %s2709_s6 = scalar_lea.vmem %s2985_s7, 1024  ;;  %s2804_s25 = smov [#allocation5]  }
  0x62   : > { %p2710_p9 = scmp.ne.s32.totalorder %s2985_s7, %s2709_s6  ;;  %s2714_s29 = sshll.u32 %s2804_s25, 4  ;;  %s2715_s29 = int_to_ptr.vmem [resolvable:$false] %s2714_s29 }
  0x63   : > { %s2716_s0 = scalar_lea.vmem %s2715_s29, 2048  ;;  %p2717_p2 = scmp.lt.s32.totalorder %s2985_s7, %s2715_s29 }
  0x64   : > { %p2712_p1 = pnand %p2710_p9, %p2666_p0  ;;  %p2718_p6 = scmp.lt.s32.totalorder %s2716_s0, %s2709_s6 }
  0x66   : > { %p2713_p5 = pneg %p2712_p1  ;;  %p2719_p8 = por %p2718_p6, %p2717_p2 }
  0x68   : > { %p2720_p10 = pnand %p2719_p8, %p2713_p5 }
  0x6a   : > { %2723 = shalt.err (!%p2720_p10)
}
  0x6b   : > { %2517 = dma.hbm_to_vmem [thread:$0]  (!%p2941_p11), %s2950_s14, 1024, %s2985_s7, %s2987_s28, %s3257_s13, %s3257_s13, %s3256_s12  }
  0x6c   : > { %p3258_p0 = scmp.ne.s32.totalorder %s3248_s23, 0 }
  0x6d   : > { %s3019_s24 = sand.u32 (!%p3258_p0), 1, %s2790_s16   ;;  %p3259_p4 = scmp.ne.s32.totalorder (!%p3258_p0), %s3246_s21, 0 }
  0x6e   : > { %221 = sbr.rel (%p3258_p0) target bundleno = 2478 (0x9ae), region = 36  ;;  %s1982_s20 = sshll.u32 (!%p3258_p0), %s3019_s24, 6 }
  0x6f   : > { %s224_s11 = scalar_lea.sflag (!%p3258_p0), [#allocation3], %s3019_s24  ;;  %s3023_s8 = scalar_lea.vmem (!%p3258_p0), [#allocation2], %s1982_s20 }
  0x75   : > { %2769 = dma.done.wait (%p3259_p4), %s224_s11, 1024  }
  0x76   : > { %2771 = vsyncadd (%p3259_p4), %s224_s11, 4294966272  ;;  %s232_s9 = sand.u32 1, %s2854_s19   ;;  %s3030_s14 = scalar_lea.vmem [#allocation5], %s1982_s20 }
  0x77   : > { %s233_s23 = scalar_lea.sflag [#allocation6], %s232_s9 }
  0x78   : > { %2773 = dma.done.wait (%p3259_p4), %s233_s23, 1024  }
  0x79   : > { %2775 = vsyncadd (%p3259_p4), %s233_s23, 4294966272  ;;  %p3260_p11 = scmp.eq.s32.totalorder %s2854_s19, 0 }
  0x7b   : > { %2777 = dma.done.wait (%p3260_p11), [#allocation6], 7232   ;;  %p3261_p13 = pmov %p3260_p11 }
  0x7c   : > { %v2563_v0 = vld [vmem:[#allocation7] sm:$0xff]   ;;  %v2564_v1 = vld [vmem:[#allocation7 + $0x8] sm:$0xff]   ;;  %v2565_v2 = vld [vmem:[#allocation7 + $0x10] sm:$0xff]   ;;  %v522_v56 = vlaneseq  ;;  %vm2806_vm0 = vmmov 0   ;;  %vm1469_vm1 = vcmask 1041409   ;;  %vm1471_vm2 = vcmask 1042434  }
  0x7d   : > { %2779 = vsyncadd (%p3261_p13), [#allocation6], 4294960064  ;;  %2205 = vmatprep.subr.bf16.mxu0 %v2563_v0  ;;  %v2566_v3 = vld [vmem:[#allocation7 + $0x18] sm:$0xff]   ;;  %v2571_v4 = vld [vmem:[%s3030_s14] sm:$0xff]   ;;  %vm1473_vm3 = vcmask 1043459   ;;  %vm1475_vm4 = vcmask 1044484  }
  0x7e   : > { %2206 = vmatpush3.bf16.msra.mxu0 %v2563_v0  ;;  %2221 = vmatprep.mubr.bf16.mxu0 %v2571_v4  ;;  %v2567_v5 = vld [vmem:[#allocation7 + $0x20] sm:$0xff]   ;;  %v2568_v6 = vld [vmem:[#allocation7 + $0x28] sm:$0xff]   ;;  %v2569_v7 = vld [vmem:[#allocation7 + $0x30] sm:$0xff]   ;;  %v3081_v57 = vshrl.u32 %v522_v56, 7  ;;  %vm1477_vm5 = vcmask 1045509   ;;  %vm1479_vm6 = vcmask 1046534  }
  0x7f   : > { %2207 = vmatprep.subr.bf16.mxu0 %v2564_v1  ;;  %v2570_v8 = vld [vmem:[#allocation7 + $0x38] sm:$0xff]   ;;  %v2572_v9 = vld [vmem:[%s3030_s14 + $0x8] sm:$0xff]   ;;  %v2573_v10 = vld [vmem:[%s3030_s14 + $0x10] sm:$0xff]   ;;  %vm1481_vm7 = vcmask 1047559   ;;  %s1985_s28 = sshll.u32 %s3019_s24, 3  ;;  %s2059_s26 = sshll.u32 %s2854_s19, 7 }
  0x80   : > { %v2574_v11 = vld [vmem:[%s3030_s14 + $0x18] sm:$0xff]   ;;  %v2575_v12 = vld [vmem:[%s3030_s14 + $0x20] sm:$0xff]   ;;  %v2576_v13 = vld [vmem:[%s3030_s14 + $0x28] sm:$0xff]   ;;  %v524_v58 = vsub.s32 0, %v3081_v57  ;;  %s269_s5 = scalar_lea.vmem [#allocation8], %s1985_s28  ;;  %s3188_s25 = scalar_lea.hbm %s3236_s4, %s2059_s26 }
  0x81   : > { %v2577_v14 = vld [vmem:[%s3030_s14 + $0x30] sm:$0xff]   ;;  %v2578_v15 = vld [vmem:[%s3030_s14 + $0x38] sm:$0xff]   ;;  %v3049_v16 = vld [vmem:[%s3023_s8] sm:$0xff]   ;;  %s1869_s10 = sshll.u32 %s269_s5, 4  ;;  %s1856_s29 = scalar_lea.sflag [#allocation4], %s3019_s24  ;;  %s3190_s10 = int_to_ptr.vmem [resolvable:$true] %s1869_s10 }
  0x82   : > { %2208 = vmatpush3.bf16.msra.mxu0 %v2564_v1  ;;  %2253 = vmatprep.mubr.bf16.mxu1 %v3049_v16  ;;  %v2587_v17 = vld [vmem:[#allocation7 + $0x40] sm:$0xff]   ;;  %v2588_v18 = vld [vmem:[#allocation7 + $0x48] sm:$0xff]   ;;  %v2589_v19 = vld [vmem:[#allocation7 + $0x50] sm:$0xff]   ;;  %s2724_s19 = scalar_lea.vmem %s3190_s10, 128  ;;  %s2807_s0 = smov [#allocation8]  }
  0x83   : > { %2209 = vmatprep.subr.bf16.mxu0 %v2565_v2  ;;  %v2590_v20 = vld [vmem:[#allocation7 + $0x58] sm:$0xff]   ;;  %v2591_v21 = vld [vmem:[#allocation7 + $0x60] sm:$0xff]   ;;  %v2592_v22 = vld [vmem:[#allocation7 + $0x68] sm:$0xff]   ;;  %p2725_p3 = scmp.ne.s32.totalorder %s3190_s10, %s2724_s19  ;;  %s2728_s20 = sshll.u32 %s2807_s0, 4  ;;  %s2729_s20 = int_to_ptr.vmem [resolvable:$false] %s2728_s20 }
  0x84   : > { %v3053_v47 = vld [vmem:[%s3023_s8 + $0x8] sm:$0xff]   ;;  %v3056_v48 = vld [vmem:[%s3023_s8 + $0x10] sm:$0xff]   ;;  %v3061_v49 = vld [vmem:[%s3023_s8 + $0x18] sm:$0xff]   ;;  %s2730_s11 = scalar_lea.vmem %s2729_s20, 256  ;;  %p2731_p1 = scmp.lt.s32.totalorder %s3190_s10, %s2729_s20 }
  0x85   : > { %v3064_v50 = vld [vmem:[%s3023_s8 + $0x20] sm:$0xff]   ;;  %v3069_v51 = vld [vmem:[%s3023_s8 + $0x28] sm:$0xff]   ;;  %v3072_v52 = vld [vmem:[%s3023_s8 + $0x30] sm:$0xff]   ;;  %p2726_p7 = pnand %p2725_p3, %p2927_p12  ;;  %p2732_p5 = scmp.lt.s32.totalorder %s2730_s11, %s2724_s19 }
  0x86   : > { %2210 = vmatpush3.bf16.msra.mxu0 %v2565_v2  ;;  %v3077_v53 = vld [vmem:[%s3023_s8 + $0x38] sm:$0xff]   ;;  %v2593_v54 = vld [vmem:[#allocation7 + $0x70] sm:$0xff]   ;;  %v3087_v59 = vld [vmem:[%s3235_s3] sm:$0xff] }
  0x87   : > { %2211 = vmatprep.subr.bf16.mxu0 %v2566_v3  ;;  %v2594_v55 = vld [vmem:[#allocation7 + $0x78] sm:$0xff]   ;;  %v525_v60 = vrot.slane %v3087_v59, %v524_v58  ;;  %p2727_p9 = pneg %p2726_p7  ;;  %p2733_p2 = por %p2732_p5, %p2731_p1 }
  0x89   : > { %p2734_p6 = pnand %p2733_p2, %p2727_p9 }
  0x8a   : > { %2212 = vmatpush3.bf16.msra.mxu0 %v2566_v3 }
  0x8b   : > { %2213 = vmatprep.subr.bf16.mxu0 %v2567_v5 }
  0x8e   : > { %2214 = vmatpush3.bf16.msra.mxu0 %v2567_v5 }
  0x8f   : > { %2215 = vmatprep.subr.bf16.mxu0 %v2568_v6 }
  0x92   : > { %2216 = vmatpush3.bf16.msra.mxu0 %v2568_v6 }
  0x93   : > { %2217 = vmatprep.subr.bf16.mxu0 %v2569_v7 }
  0x96   : > { %2218 = vmatpush3.bf16.msra.mxu0 %v2569_v7 }
  0x97   : > { %2219 = vmatprep.subr.bf16.mxu0 %v2570_v8 }
  0x9a   : > { %2220 = vmatpush3.bf16.msra.mxu0 %v2570_v8 }
  0x9b   : > { %2269 = vmatprep.subr.bf16.mxu0 %v2587_v17 }
  0x9d   : > { %2222 = vmatmul.mubr.bf16.vlgmr.msra.gmra.mrb[0].mxu0 %v2572_v9 }
  0x9e   : > { %2225 = vmatprep.mubr.bf16.mxu0 %v2573_v10  ;;  %2270 = vmatpush3.bf16.msra.mxu0 %v2587_v17 }
  0x9f   : > { %2271 = vmatprep.subr.bf16.mxu0 %v2588_v18 }
  0xa2   : > { %2272 = vmatpush3.bf16.msra.mxu0 %v2588_v18 }
  0xa3   : > { %2273 = vmatprep.subr.bf16.mxu0 %v2589_v19 }
  0xa5   : > { %2226 = vmatmul.mubr.bf16.gmra.mrb[4].mxu0 %v2574_v11 }
  0xa6   : > { %2229 = vmatprep.mubr.bf16.mxu0 %v2575_v12  ;;  %2274 = vmatpush3.bf16.msra.mxu0 %v2589_v19 }
  0xa7   : > { %2275 = vmatprep.subr.bf16.mxu0 %v2590_v20 }
  0xaa   : > { %2276 = vmatpush3.bf16.msra.mxu0 %v2590_v20 }
  0xab   : > { %2277 = vmatprep.subr.bf16.mxu0 %v2591_v21 }
  0xad   : > { %2230 = vmatmul.mubr.bf16.gmra.mrb[8].mxu0 %v2576_v13 }
  0xae   : > { %2233 = vmatprep.mubr.bf16.mxu0 %v2577_v14  ;;  %2278 = vmatpush3.bf16.msra.mxu0 %v2591_v21 }
  0xaf   : > { %2279 = vmatprep.subr.bf16.mxu0 %v2592_v22 }
  0xb2   : > { %2280 = vmatpush3.bf16.msra.mxu0 %v2592_v22 }
  0xb3   : > { %2281 = vmatprep.subr.bf16.mxu0 %v2593_v54 }
  0xb5   : > { %2234 = vmatmul.mubr.bf16.gmra.mrb[12].mxu0 %v2578_v15 }
  0xb6   : > { %2282 = vmatpush3.bf16.msra.mxu0 %v2593_v54 }
  0xb7   : > { %2283 = vmatprep.subr.bf16.mxu0 %v2594_v55 }
  0xba   : > { %2284 = vmatpush3.bf16.msra.mxu0 %v2594_v55 }
 0x170   : > { %v2223_v23 = vpop.f32.mrb[0].mxu0 }
 0x171   : > { %v451_v24 = vpop.f32.mrb[1].mxu0 }
 0x172   : > { %v2224_v25 = vpop.f32.mrb[2].mxu0 }
 0x173   : > { %v515_v26 = vpack.c.bf16 %v2224_v25, %v2223_v23  ;;  %v454_v27 = vpop.f32.mrb[3].mxu0 }
 0x174   : > { %v514_v28 = vpack.c.bf16 %v454_v27, %v451_v24 }
 0x176   : > { %2237 = vmatprep.subr.bf16.mxu1 %v514_v28 }
 0x177   : > { %2238 = vmatpush3.bf16.msra.mxu1 %v514_v28 }
 0x178   : > { %v2227_v29 = vpop.f32.mrb[4].mxu0  ;;  %2239 = vmatprep.subr.bf16.mxu1 %v515_v26 }
 0x179   : > { %v467_v30 = vpop.f32.mrb[5].mxu0 }
 0x17a   : > { %v2228_v31 = vpop.f32.mrb[6].mxu0 }
 0x17b   : > { %v517_v32 = vpack.c.bf16 %v2228_v31, %v2227_v29  ;;  %v470_v33 = vpop.f32.mrb[7].mxu0  ;;  %2240 = vmatpush3.bf16.msra.mxu1 %v515_v26 }
 0x17c   : > { %v516_v34 = vpack.c.bf16 %v470_v33, %v467_v30 }
 0x17e   : > { %2241 = vmatprep.subr.bf16.mxu1 %v516_v34 }
 0x17f   : > { %2242 = vmatpush3.bf16.msra.mxu1 %v516_v34 }
 0x180   : > { %v2231_v35 = vpop.f32.mrb[8].mxu0  ;;  %2243 = vmatprep.subr.bf16.mxu1 %v517_v32 }
 0x181   : > { %v483_v36 = vpop.f32.mrb[9].mxu0 }
 0x182   : > { %v2232_v37 = vpop.f32.mrb[10].mxu0 }
 0x183   : > { %v519_v38 = vpack.c.bf16 %v2232_v37, %v2231_v35  ;;  %v486_v39 = vpop.f32.mrb[11].mxu0  ;;  %2244 = vmatpush3.bf16.msra.mxu1 %v517_v32 }
 0x184   : > { %v518_v40 = vpack.c.bf16 %v486_v39, %v483_v36 }
 0x186   : > { %2245 = vmatprep.subr.bf16.mxu1 %v518_v40 }
 0x187   : > { %2246 = vmatpush3.bf16.msra.mxu1 %v518_v40 }
 0x188   : > { %v2235_v41 = vpop.f32.mrb[12].mxu0  ;;  %2247 = vmatprep.subr.bf16.mxu1 %v519_v38 }
 0x189   : > { %v499_v42 = vpop.f32.mrb[13].mxu0 }
 0x18a   : > { %v2236_v43 = vpop.f32.mrb[14].mxu0 }
 0x18b   : > { %v521_v44 = vpack.c.bf16 %v2236_v43, %v2235_v41  ;;  %v502_v45 = vpop.f32.mrb[15].mxu0  ;;  %2248 = vmatpush3.bf16.msra.mxu1 %v519_v38 }
 0x18c   : > { %v520_v46 = vpack.c.bf16 %v502_v45, %v499_v42 }
 0x18e   : > { %2249 = vmatprep.subr.bf16.mxu1 %v520_v46 }
 0x18f   : > { %2250 = vmatpush3.bf16.msra.mxu1 %v520_v46 }
 0x190   : > { %2251 = vmatprep.subr.bf16.mxu1 %v521_v44 }
 0x193   : > { %2252 = vmatpush3.bf16.msra.mxu1 %v521_v44 }
 0x196   : > { %2254 = vmatmul.mubr.bf16.vlgmr.msra.gmra.mrb[0].mxu1 %v3053_v47 }
 0x197   : > { %2257 = vmatprep.mubr.bf16.mxu1 %v3056_v48 }
 0x19e   : > { %2258 = vmatmul.mubr.bf16.gmra.mrb[4].mxu1 %v3061_v49 }
 0x19f   : > { %2261 = vmatprep.mubr.bf16.mxu1 %v3064_v50 }
 0x1a6   : > { %2262 = vmatmul.mubr.bf16.gmra.mrb[8].mxu1 %v3069_v51 }
 0x1a7   : > { %2265 = vmatprep.mubr.bf16.mxu1 %v3072_v52 }
 0x1ae   : > { %2266 = vmatmul.mubr.bf16.gmra.mrb[12].mxu1 %v3077_v53 }
 0x1af   : > { %2317 = vmatprep.mubr.bf16.mxu1 %v3049_v16 }
 0x269   : > { %v2255_v61 = vpop.f32.mrb[0].mxu1 }
 0x26a   : > { %v617_v62 = vadd.f32 %v2255_v61, %v525_v60  ;;  %v608_v63 = vpop.f32.mrb[1].mxu1 }
 0x26b   : > { %v609_v0 = vadd.f32 %v608_v63, %v525_v60  ;;  %v2256_v1 = vpop.f32.mrb[2].mxu1 }
 0x26c   : > { %v620_v2 = vadd.f32 %v2256_v1, %v525_v60  ;;  %v611_v3 = vpop.f32.mrb[3].mxu1  ;;  %v673_v5 = vmax.f32 %v617_v62, 0.0  ;;  %v2596_v1 = vld [vmem:[#allocation7 + $0x88] sm:$0xff]  }
 0x26d   : > { %v612_v4 = vadd.f32 %v611_v3, %v525_v60  ;;  %v671_v7 = vmax.f32 %v609_v0, 0.0  ;;  %v2595_v0 = vld [vmem:[#allocation7 + $0x80] sm:$0xff]   ;;  %v2598_v3 = vld [vmem:[#allocation7 + $0x98] sm:$0xff]  }
 0x26e   : > { %v674_v6 = vmax.f32 %v620_v2, 0.0  ;;  %2333 = vmatprep.subr.bf16.mxu0 %v2595_v0  ;;  %v2597_v2 = vld [vmem:[#allocation7 + $0x90] sm:$0xff]  }
 0x26f   : > { %v672_v8 = vmax.f32 %v612_v4, 0.0  ;;  %v2600_v4 = vld [vmem:[#allocation7 + $0xa8] sm:$0xff]  }
 0x270   : > { %v688_v9 = vpack.c.bf16 %v674_v6, %v673_v5 }
 0x271   : > { %v687_v10 = vpack.c.bf16 %v672_v8, %v671_v7  ;;  %v2259_v11 = vpop.f32.mrb[4].mxu1 }
 0x272   : > { %v633_v12 = vadd.f32 %v2259_v11, %v525_v60  ;;  %v624_v13 = vpop.f32.mrb[5].mxu1 }
 0x273   : > { %v625_v14 = vadd.f32 %v624_v13, %v525_v60  ;;  %v2260_v15 = vpop.f32.mrb[6].mxu1  ;;  %2285 = vmatprep.mubr.bf16.mxu0 %v687_v10 }
 0x274   : > { %v636_v17 = vadd.f32 %v2260_v15, %v525_v60  ;;  %v627_v18 = vpop.f32.mrb[7].mxu1  ;;  %2286 = vmatmul.mubr.bf16.vlgmr.msra.gmra.mrb[16].mxu0 %v688_v9  ;;  %v677_v20 = vmax.f32 %v633_v12, 0.0 }
 0x275   : > { %v628_v19 = vadd.f32 %v627_v18, %v525_v60  ;;  %v675_v22 = vmax.f32 %v625_v14, 0.0  ;;  %2334 = vmatpush3.bf16.msra.mxu0 %v2595_v0 }
 0x276   : > { %v678_v21 = vmax.f32 %v636_v17, 0.0  ;;  %2335 = vmatprep.subr.bf16.mxu0 %v2596_v1 }
 0x277   : > { %v676_v23 = vmax.f32 %v628_v19, 0.0 }
 0x278   : > { %v690_v24 = vpack.c.bf16 %v678_v21, %v677_v20 }
 0x279   : > { %v689_v25 = vpack.c.bf16 %v676_v23, %v675_v22  ;;  %v2263_v26 = vpop.f32.mrb[8].mxu1  ;;  %2336 = vmatpush3.bf16.msra.mxu0 %v2596_v1 }
 0x27a   : > { %v649_v27 = vadd.f32 %v2263_v26, %v525_v60  ;;  %v640_v28 = vpop.f32.mrb[9].mxu1  ;;  %2337 = vmatprep.subr.bf16.mxu0 %v2597_v2 }
 0x27b   : > { %v641_v29 = vadd.f32 %v640_v28, %v525_v60  ;;  %v2264_v30 = vpop.f32.mrb[10].mxu1  ;;  %2289 = vmatprep.mubr.bf16.mxu0 %v689_v25 }
 0x27c   : > { %v652_v31 = vadd.f32 %v2264_v30, %v525_v60  ;;  %v643_v32 = vpop.f32.mrb[11].mxu1  ;;  %2290 = vmatmul.mubr.bf16.gmra.mrb[20].mxu0 %v690_v24  ;;  %v681_v34 = vmax.f32 %v649_v27, 0.0  ;;  %v2601_v30 = vld [vmem:[#allocation7 + $0xb0] sm:$0xff]  }
 0x27d   : > { %v644_v33 = vadd.f32 %v643_v32, %v525_v60  ;;  %v679_v36 = vmax.f32 %v641_v29, 0.0  ;;  %2338 = vmatpush3.bf16.msra.mxu0 %v2597_v2  ;;  %v866_v32 = vsub.s32 1, %v3081_v57 }
 0x27e   : > { %v682_v35 = vmax.f32 %v652_v31, 0.0  ;;  %2339 = vmatprep.subr.bf16.mxu0 %v2598_v3  ;;  %v2602_v31 = vld [vmem:[#allocation7 + $0xb8] sm:$0xff]  }
 0x27f   : > { %v680_v37 = vmax.f32 %v644_v33, 0.0  ;;  %v867_v33 = vrot.slane %v3087_v59, %v866_v32 }
 0x280   : > { %v692_v38 = vpack.c.bf16 %v682_v35, %v681_v34 }
 0x281   : > { %v691_v39 = vpack.c.bf16 %v680_v37, %v679_v36  ;;  %v2267_v40 = vpop.f32.mrb[12].mxu1  ;;  %2340 = vmatpush3.bf16.msra.mxu0 %v2598_v3 }
 0x282   : > { %v665_v41 = vadd.f32 %v2267_v40, %v525_v60  ;;  %v656_v42 = vpop.f32.mrb[13].mxu1 }
 0x283   : > { %v657_v43 = vadd.f32 %v656_v42, %v525_v60  ;;  %v2268_v44 = vpop.f32.mrb[14].mxu1  ;;  %2293 = vmatprep.mubr.bf16.mxu0 %v691_v39 }
 0x284   : > { %v668_v45 = vadd.f32 %v2268_v44, %v525_v60  ;;  %v659_v46 = vpop.f32.mrb[15].mxu1  ;;  %2294 = vmatmul.mubr.bf16.gmra.mrb[24].mxu0 %v692_v38  ;;  %v685_v55 = vmax.f32 %v665_v41, 0.0 }
 0x285   : > { %v660_v54 = vadd.f32 %v659_v46, %v525_v60  ;;  %v683_v58 = vmax.f32 %v657_v43, 0.0  ;;  %v2599_v60 = vld [vmem:[#allocation7 + $0xa0] sm:$0xff]  }
 0x286   : > { %v686_v56 = vmax.f32 %v668_v45, 0.0  ;;  %2341 = vmatprep.subr.bf16.mxu0 %v2599_v60 }
 0x287   : > { %v684_v61 = vmax.f32 %v660_v54, 0.0  ;;  %2342 = vmatpush3.bf16.msra.mxu0 %v2599_v60 }
 0x288   : > { %v694_v62 = vpack.c.bf16 %v686_v56, %v685_v55  ;;  %2343 = vmatprep.subr.bf16.mxu0 %v2600_v4 }
 0x289   : > { %v693_v63 = vpack.c.bf16 %v684_v61, %v683_v58 }
 0x28b   : > { %2297 = vmatprep.mubr.bf16.mxu0 %v693_v63  ;;  %2344 = vmatpush3.bf16.msra.mxu0 %v2600_v4 }
 0x28c   : > { %2298 = vmatmul.mubr.bf16.gmra.mrb[28].mxu0 %v694_v62  ;;  %2345 = vmatprep.subr.bf16.mxu0 %v2601_v30 }
 0x28f   : > { %2346 = vmatpush3.bf16.msra.mxu0 %v2601_v30 }
 0x290   : > { %2347 = vmatprep.subr.bf16.mxu0 %v2602_v31 }
 0x293   : > { %2348 = vmatpush3.bf16.msra.mxu0 %v2602_v31 }
 0x347   : > { %v2287_v5 = vpop.f32.mrb[16].mxu0 }
 0x348   : > { %v793_v6 = vpop.f32.mrb[17].mxu0 }
 0x349   : > { %v2288_v7 = vpop.f32.mrb[18].mxu0 }
 0x34a   : > { %v857_v8 = vpack.c.bf16 %v2288_v7, %v2287_v5  ;;  %v796_v9 = vpop.f32.mrb[19].mxu0 }
 0x34b   : > { %v856_v10 = vpack.c.bf16 %v796_v9, %v793_v6 }
 0x34d   : > { %2301 = vmatprep.subr.bf16.mxu1 %v856_v10 }
 0x34e   : > { %2302 = vmatpush3.bf16.msra.mxu1 %v856_v10 }
 0x34f   : > { %v2291_v11 = vpop.f32.mrb[20].mxu0  ;;  %2303 = vmatprep.subr.bf16.mxu1 %v857_v8 }
 0x350   : > { %v809_v12 = vpop.f32.mrb[21].mxu0 }
 0x351   : > { %v2292_v13 = vpop.f32.mrb[22].mxu0 }
 0x352   : > { %v859_v14 = vpack.c.bf16 %v2292_v13, %v2291_v11  ;;  %v812_v15 = vpop.f32.mrb[23].mxu0  ;;  %2304 = vmatpush3.bf16.msra.mxu1 %v857_v8 }
 0x353   : > { %v858_v17 = vpack.c.bf16 %v812_v15, %v809_v12 }
 0x355   : > { %2305 = vmatprep.subr.bf16.mxu1 %v858_v17 }
 0x356   : > { %2306 = vmatpush3.bf16.msra.mxu1 %v858_v17 }
 0x357   : > { %v2295_v18 = vpop.f32.mrb[24].mxu0  ;;  %2307 = vmatprep.subr.bf16.mxu1 %v859_v14 }
 0x358   : > { %v825_v19 = vpop.f32.mrb[25].mxu0 }
 0x359   : > { %v2296_v20 = vpop.f32.mrb[26].mxu0 }
 0x35a   : > { %v861_v21 = vpack.c.bf16 %v2296_v20, %v2295_v18  ;;  %v828_v22 = vpop.f32.mrb[27].mxu0  ;;  %2308 = vmatpush3.bf16.msra.mxu1 %v859_v14 }
 0x35b   : > { %v860_v23 = vpack.c.bf16 %v828_v22, %v825_v19 }
 0x35d   : > { %2309 = vmatprep.subr.bf16.mxu1 %v860_v23 }
 0x35e   : > { %2310 = vmatpush3.bf16.msra.mxu1 %v860_v23 }
 0x35f   : > { %v2299_v24 = vpop.f32.mrb[28].mxu0  ;;  %2311 = vmatprep.subr.bf16.mxu1 %v861_v21 }
 0x360   : > { %v841_v25 = vpop.f32.mrb[29].mxu0 }
 0x361   : > { %v2300_v26 = vpop.f32.mrb[30].mxu0 }
 0x362   : > { %v863_v27 = vpack.c.bf16 %v2300_v26, %v2299_v24  ;;  %v844_v28 = vpop.f32.mrb[31].mxu0  ;;  %2312 = vmatpush3.bf16.msra.mxu1 %v861_v21 }
 0x363   : > { %v862_v29 = vpack.c.bf16 %v844_v28, %v841_v25 }
 0x365   : > { %2313 = vmatprep.subr.bf16.mxu1 %v862_v29 }
 0x366   : > { %2314 = vmatpush3.bf16.msra.mxu1 %v862_v29 }
 0x367   : > { %2315 = vmatprep.subr.bf16.mxu1 %v863_v27 }
 0x36a   : > { %2316 = vmatpush3.bf16.msra.mxu1 %v863_v27 }
 0x36d   : > { %2318 = vmatmul.mubr.bf16.vlgmr.msra.gmra.mrb[16].mxu1 %v3053_v47 }
 0x36e   : > { %2321 = vmatprep.mubr.bf16.mxu1 %v3056_v48 }
 0x375   : > { %2322 = vmatmul.mubr.bf16.gmra.mrb[20].mxu1 %v3061_v49 }
 0x376   : > { %2325 = vmatprep.mubr.bf16.mxu1 %v3064_v50 }
 0x37d   : > { %2326 = vmatmul.mubr.bf16.gmra.mrb[24].mxu1 %v3069_v51 }
 0x37e   : > { %2329 = vmatprep.mubr.bf16.mxu1 %v3072_v52 }
 0x385   : > { %2330 = vmatmul.mubr.bf16.gmra.mrb[28].mxu1 %v3077_v53 }
 0x386   : > { %2381 = vmatprep.mubr.bf16.mxu1 %v3049_v16 }
 0x440   : > { %v2319_v34 = vpop.f32.mrb[16].mxu1 }
 0x441   : > { %v911_v35 = vadd.f32 %v2319_v34, %v867_v33  ;;  %v902_v36 = vpop.f32.mrb[17].mxu1 }
 0x442   : > { %v903_v37 = vadd.f32 %v902_v36, %v867_v33  ;;  %v2320_v38 = vpop.f32.mrb[18].mxu1 }
 0x443   : > { %v914_v39 = vadd.f32 %v2320_v38, %v867_v33  ;;  %v905_v40 = vpop.f32.mrb[19].mxu1  ;;  %v967_v42 = vmax.f32 %v911_v35, 0.0 }
 0x444   : > { %v906_v41 = vadd.f32 %v905_v40, %v867_v33  ;;  %v965_v43 = vmax.f32 %v903_v37, 0.0 }
 0x445   : > { %v968_v16 = vmax.f32 %v914_v39, 0.0 }
 0x446   : > { %v966_v44 = vmax.f32 %v906_v41, 0.0 }
 0x447   : > { %v982_v45 = vpack.c.bf16 %v968_v16, %v967_v42 }
 0x448   : > { %v981_v46 = vpack.c.bf16 %v966_v44, %v965_v43  ;;  %v2323_v54 = vpop.f32.mrb[20].mxu1 }
 0x449   : > { %v927_v55 = vadd.f32 %v2323_v54, %v867_v33  ;;  %v918_v56 = vpop.f32.mrb[21].mxu1 }
 0x44a   : > { %v919_v58 = vadd.f32 %v918_v56, %v867_v33  ;;  %v2324_v61 = vpop.f32.mrb[22].mxu1  ;;  %2349 = vmatprep.mubr.bf16.mxu0 %v981_v46 }
 0x44b   : > { %v930_v62 = vadd.f32 %v2324_v61, %v867_v33  ;;  %v921_v63 = vpop.f32.mrb[23].mxu1  ;;  %2350 = vmatmul.mubr.bf16.vlgmr.msra.gmra.mrb[32].mxu0 %v982_v45  ;;  %v971_v1 = vmax.f32 %v927_v55, 0.0 }
 0x44c   : > { %v922_v0 = vadd.f32 %v921_v63, %v867_v33  ;;  %v969_v3 = vmax.f32 %v919_v58, 0.0 }
 0x44d   : > { %v972_v2 = vmax.f32 %v930_v62, 0.0 }
 0x44e   : > { %v970_v60 = vmax.f32 %v922_v0, 0.0 }
 0x44f   : > { %v984_v4 = vpack.c.bf16 %v972_v2, %v971_v1 }
 0x450   : > { %v983_v5 = vpack.c.bf16 %v970_v60, %v969_v3  ;;  %v2327_v6 = vpop.f32.mrb[24].mxu1  ;;  %v2805_v60 = vmov 0.0  }
 0x451   : > { %v943_v7 = vadd.f32 %v2327_v6, %v867_v33  ;;  %v934_v8 = vpop.f32.mrb[25].mxu1  ;;  %2397 = vmatprep.subr.bf16.mxu0 %v2805_v60 }
 0x452   : > { %v935_v9 = vadd.f32 %v934_v8, %v867_v33  ;;  %v2328_v10 = vpop.f32.mrb[26].mxu1  ;;  %2353 = vmatprep.mubr.bf16.mxu0 %v983_v5  ;;  %v1160_v5 = vsub.s32 2, %v3081_v57 }
 0x453   : > { %v946_v11 = vadd.f32 %v2328_v10, %v867_v33  ;;  %v937_v12 = vpop.f32.mrb[27].mxu1  ;;  %2354 = vmatmul.mubr.bf16.gmra.mrb[36].mxu0 %v984_v4  ;;  %v975_v14 = vmax.f32 %v943_v7, 0.0  ;;  %v2603_v4 = vld [vmem:[#allocation7 + $0x100] sm:$0xff]  }
 0x454   : > { %v938_v13 = vadd.f32 %v937_v12, %v867_v33  ;;  %v973_v17 = vmax.f32 %v935_v9, 0.0  ;;  %v3123_v6 = vrot.slane %v3087_v59, %v1160_v5 }
 0x455   : > { %v976_v15 = vmax.f32 %v946_v11, 0.0 }
 0x456   : > { %v974_v18 = vmax.f32 %v938_v13, 0.0 }
 0x457   : > { %v986_v19 = vpack.c.bf16 %v976_v15, %v975_v14 }
 0x458   : > { %v985_v20 = vpack.c.bf16 %v974_v18, %v973_v17  ;;  %v2331_v21 = vpop.f32.mrb[28].mxu1 }
 0x459   : > { %v959_v22 = vadd.f32 %v2331_v21, %v867_v33  ;;  %v950_v23 = vpop.f32.mrb[29].mxu1 }
 0x45a   : > { %v951_v24 = vadd.f32 %v950_v23, %v867_v33  ;;  %v2332_v25 = vpop.f32.mrb[30].mxu1  ;;  %2357 = vmatprep.mubr.bf16.mxu0 %v985_v20 }
 0x45b   : > { %v962_v26 = vadd.f32 %v2332_v25, %v867_v33  ;;  %v953_v27 = vpop.f32.mrb[31].mxu1  ;;  %2358 = vmatmul.mubr.bf16.gmra.mrb[40].mxu0 %v986_v19  ;;  %v979_v29 = vmax.f32 %v959_v22, 0.0 }
 0x45c   : > { %v954_v28 = vadd.f32 %v953_v27, %v867_v33  ;;  %v977_v31 = vmax.f32 %v951_v24, 0.0 }
 0x45d   : > { %v980_v30 = vmax.f32 %v962_v26, 0.0 }
 0x45e   : > { %v978_v32 = vmax.f32 %v954_v28, 0.0 }
 0x45f   : > { %v988_v34 = vpack.c.bf16 %v980_v30, %v979_v29 }
 0x460   : > { %v987_v35 = vpack.c.bf16 %v978_v32, %v977_v31 }
 0x462   : > { %2361 = vmatprep.mubr.bf16.mxu0 %v987_v35 }
 0x463   : > { %2362 = vmatmul.mubr.bf16.gmra.mrb[44].mxu0 %v988_v34 }
 0x464   : > { %2413 = vmatprep.mubr.msk.bf16.mxu0 %vm2806_vm0, %v2805_v60 }
 0x51e   : > { %v2351_v36 = vpop.f32.mrb[32].mxu0 }
 0x51f   : > { %v1087_v37 = vpop.f32.mrb[33].mxu0 }
 0x520   : > { %v2352_v38 = vpop.f32.mrb[34].mxu0 }
 0x521   : > { %v1151_v39 = vpack.c.bf16 %v2352_v38, %v2351_v36  ;;  %v1090_v40 = vpop.f32.mrb[35].mxu0 }
 0x522   : > { %v1150_v41 = vpack.c.bf16 %v1090_v40, %v1087_v37 }
 0x524   : > { %2365 = vmatprep.subr.bf16.mxu1 %v1150_v41 }
 0x525   : > { %2366 = vmatpush3.bf16.msra.mxu1 %v1150_v41 }
 0x526   : > { %v2355_v42 = vpop.f32.mrb[36].mxu0  ;;  %2367 = vmatprep.subr.bf16.mxu1 %v1151_v39 }
 0x527   : > { %v1103_v16 = vpop.f32.mrb[37].mxu0 }
 0x528   : > { %v2356_v33 = vpop.f32.mrb[38].mxu0 }
 0x529   : > { %v1153_v43 = vpack.c.bf16 %v2356_v33, %v2355_v42  ;;  %v1106_v44 = vpop.f32.mrb[39].mxu0  ;;  %2368 = vmatpush3.bf16.msra.mxu1 %v1151_v39 }
 0x52a   : > { %v1152_v45 = vpack.c.bf16 %v1106_v44, %v1103_v16 }
 0x52c   : > { %2369 = vmatprep.subr.bf16.mxu1 %v1152_v45 }
 0x52d   : > { %2370 = vmatpush3.bf16.msra.mxu1 %v1152_v45 }
 0x52e   : > { %v2359_v46 = vpop.f32.mrb[40].mxu0  ;;  %2371 = vmatprep.subr.bf16.mxu1 %v1153_v43 }
 0x52f   : > { %v1119_v54 = vpop.f32.mrb[41].mxu0 }
 0x530   : > { %v2360_v55 = vpop.f32.mrb[42].mxu0 }
 0x531   : > { %v1155_v56 = vpack.c.bf16 %v2360_v55, %v2359_v46  ;;  %v1122_v58 = vpop.f32.mrb[43].mxu0  ;;  %2372 = vmatpush3.bf16.msra.mxu1 %v1153_v43 }
 0x532   : > { %v1154_v61 = vpack.c.bf16 %v1122_v58, %v1119_v54 }
 0x534   : > { %2373 = vmatprep.subr.bf16.mxu1 %v1154_v61 }
 0x535   : > { %2374 = vmatpush3.bf16.msra.mxu1 %v1154_v61 }
 0x536   : > { %v2363_v62 = vpop.f32.mrb[44].mxu0  ;;  %2375 = vmatprep.subr.bf16.mxu1 %v1155_v56 }
 0x537   : > { %v1135_v63 = vpop.f32.mrb[45].mxu0 }
 0x538   : > { %v2364_v0 = vpop.f32.mrb[46].mxu0 }
 0x539   : > { %v1157_v1 = vpack.c.bf16 %v2364_v0, %v2363_v62  ;;  %v1138_v2 = vpop.f32.mrb[47].mxu0  ;;  %2376 = vmatpush3.bf16.msra.mxu1 %v1155_v56 }
 0x53a   : > { %v1156_v3 = vpack.c.bf16 %v1138_v2, %v1135_v63 }
 0x53c   : > { %2377 = vmatprep.subr.bf16.mxu1 %v1156_v3 }
 0x53d   : > { %2378 = vmatpush3.bf16.msra.mxu1 %v1156_v3 }
 0x53e   : > { %2379 = vmatprep.subr.bf16.mxu1 %v1157_v1 }
 0x541   : > { %2380 = vmatpush3.bf16.msra.mxu1 %v1157_v1 }
 0x542   : > { %2417 = vmatprep.subr.bf16.mxu1 %v2805_v60 }
 0x544   : > { %2382 = vmatmul.mubr.bf16.vlgmr.msra.gmra.mrb[32].mxu1 %v3053_v47  ;;  %v2604_v47 = vld [vmem:[#allocation7 + $0x108] sm:$0xff]  }
 0x545   : > { %2385 = vmatprep.mubr.bf16.mxu1 %v3056_v48  ;;  %2418 = vmatpush3.bf16.msra.mxu1 %v2603_v4  ;;  %v2605_v48 = vld [vmem:[#allocation7 + $0x110] sm:$0xff]  }
 0x546   : > { %2419 = vmatprep.subr.bf16.mxu1 %v2805_v60 }
 0x549   : > { %2420 = vmatpush3.bf16.msra.mxu1 %v2604_v47 }
 0x54a   : > { %2421 = vmatprep.subr.bf16.mxu1 %v2805_v60 }
 0x54c   : > { %2386 = vmatmul.mubr.bf16.gmra.mrb[36].mxu1 %v3061_v49  ;;  %v2606_v49 = vld [vmem:[#allocation7 + $0x118] sm:$0xff]  }
 0x54d   : > { %2389 = vmatprep.mubr.bf16.mxu1 %v3064_v50  ;;  %2422 = vmatpush3.bf16.msra.mxu1 %v2605_v48  ;;  %v2607_v50 = vld [vmem:[#allocation7 + $0x120] sm:$0xff]  }
 0x54e   : > { %2423 = vmatprep.subr.bf16.mxu1 %v2805_v60 }
 0x551   : > { %2424 = vmatpush3.bf16.msra.mxu1 %v2606_v49 }
 0x552   : > { %2425 = vmatprep.subr.bf16.mxu1 %v2805_v60 }
 0x554   : > { %2390 = vmatmul.mubr.bf16.gmra.mrb[40].mxu1 %v3069_v51  ;;  %v2608_v51 = vld [vmem:[#allocation7 + $0x128] sm:$0xff]  }
 0x555   : > { %2393 = vmatprep.mubr.bf16.mxu1 %v3072_v52  ;;  %2426 = vmatpush3.bf16.msra.mxu1 %v2607_v50  ;;  %v2609_v52 = vld [vmem:[#allocation7 + $0x130] sm:$0xff]  }
 0x556   : > { %2427 = vmatprep.subr.bf16.mxu1 %v2805_v60 }
 0x559   : > { %2428 = vmatpush3.bf16.msra.mxu1 %v2608_v51 }
 0x55a   : > { %2429 = vmatprep.subr.bf16.mxu1 %v2805_v60 }
 0x55c   : > { %2394 = vmatmul.mubr.bf16.gmra.mrb[44].mxu1 %v3077_v53  ;;  %v2610_v53 = vld [vmem:[#allocation7 + $0x138] sm:$0xff]  }
 0x55d   : > { %2433 = vmatprep.mubr.msk.bf16.mxu1 %vm2806_vm0, %v2805_v60  ;;  %2430 = vmatpush3.bf16.msra.mxu1 %v2609_v52 }
 0x55e   : > { %2431 = vmatprep.subr.bf16.mxu1 %v2805_v60 }
 0x561   : > { %2432 = vmatpush3.bf16.msra.mxu1 %v2610_v53 }
 0x562   : > { %2457 = vmatprep.subr.bf16.mxu1 %v2805_v60 }
 0x617   : > { %v2383_v7 = vpop.f32.mrb[32].mxu1 }
 0x618   : > { %v1196_v8 = vpop.f32.mrb[33].mxu1  ;;  %v1205_v10 = vadd.f32 %v2383_v7, %v3123_v6 }
 0x619   : > { %v2384_v9 = vpop.f32.mrb[34].mxu1  ;;  %v1197_v13 = vadd.f32 %v1196_v8, %v3123_v6 }
 0x61a   : > { %v1208_v11 = vadd.f32 %v2384_v9, %v3123_v6  ;;  %v1199_v12 = vpop.f32.mrb[35].mxu1 }
 0x61b   : > { %v1200_v14 = vadd.f32 %v1199_v12, %v3123_v6 }
 0x61c   : > { %v1260_v15 = vpack.c.bf16 %v1208_v11, %v1205_v10 }
 0x61d   : > { %v1259_v17 = vpack.c.bf16 %v1200_v14, %v1197_v13 }
 0x61e   : > { %v1318_v18 = vunpack.i.l.bf16 %v1260_v15  ;;  %v1319_v19 = vunpack.i.h.bf16 %v1260_v15 }
 0x61f   : > { %v1308_v20 = vunpack.i.l.bf16 %v1259_v17  ;;  %v1309_v21 = vunpack.i.h.bf16 %v1259_v17  ;;  %v2387_v59 = vpop.f32.mrb[36].mxu1  ;;  %2398 = vmatpush3.bf16.msra.mxu0 %v1259_v17 }
 0x620   : > { %v1320_v22 = vmax.f32 %v1318_v18, %v1319_v19  ;;  %v1212_v23 = vpop.f32.mrb[37].mxu1  ;;  %2399 = vmatprep.subr.bf16.mxu0 %v2805_v60  ;;  %v1221_v27 = vadd.f32 %v2387_v59, %v3123_v6 }
 0x621   : > { %v1310_v24 = vmax.f32 %v1308_v20, %v1309_v21  ;;  %v2388_v25 = vpop.f32.mrb[38].mxu1  ;;  %v1213_v31 = vadd.f32 %v1212_v23, %v3123_v6 }
 0x622   : > { %v1321_v26 = vrot.slane %v1320_v22, 4  ;;  %v1224_v28 = vadd.f32 %v2388_v25, %v3123_v6  ;;  %v1215_v29 = vpop.f32.mrb[39].mxu1 }
 0x623   : > { %v1311_v30 = vrot.slane %v1310_v24, 4  ;;  %v1216_v32 = vadd.f32 %v1215_v29, %v3123_v6  ;;  %2400 = vmatpush3.bf16.msra.mxu0 %v1260_v15 }
 0x624   : > { %v1322_v34 = vmax.f32 %v1320_v22, %v1321_v26  ;;  %v1262_v35 = vpack.c.bf16 %v1224_v28, %v1221_v27  ;;  %2401 = vmatprep.subr.bf16.mxu0 %v2805_v60 }
 0x625   : > { %v1312_v36 = vmax.f32 %v1310_v24, %v1311_v30  ;;  %v1261_v37 = vpack.c.bf16 %v1216_v32, %v1213_v31 }
 0x626   : > { %v1323_v38 = vrot.slane %v1322_v34, 2  ;;  %v1338_v39 = vunpack.i.l.bf16 %v1262_v35  ;;  %v1339_v40 = vunpack.i.h.bf16 %v1262_v35 }
 0x627   : > { %v1313_v41 = vrot.slane %v1312_v36, 2  ;;  %v1328_v42 = vunpack.i.l.bf16 %v1261_v37  ;;  %v1329_v16 = vunpack.i.h.bf16 %v1261_v37  ;;  %v2391_v33 = vpop.f32.mrb[40].mxu1  ;;  %2402 = vmatpush3.bf16.msra.mxu0 %v1261_v37 }
 0x628   : > { %v1324_v43 = vmax.f32 %v1322_v34, %v1323_v38  ;;  %v1340_v44 = vmax.f32 %v1338_v39, %v1339_v40  ;;  %v1228_v45 = vpop.f32.mrb[41].mxu1  ;;  %2403 = vmatprep.subr.bf16.mxu0 %v2805_v60  ;;  %v1237_v61 = vadd.f32 %v2391_v33, %v3123_v6 }
 0x629   : > { %v1314_v46 = vmax.f32 %v1312_v36, %v1313_v41  ;;  %v1330_v54 = vmax.f32 %v1328_v42, %v1329_v16  ;;  %v2392_v55 = vpop.f32.mrb[42].mxu1  ;;  %v1229_v2 = vadd.f32 %v1228_v45, %v3123_v6 }
 0x62a   : > { %v1325_v56 = vrot.slane %v1324_v43, 1  ;;  %v1341_v58 = vrot.slane %v1340_v44, 4  ;;  %v1240_v62 = vadd.f32 %v2392_v55, %v3123_v6  ;;  %v1231_v63 = vpop.f32.mrb[43].mxu1 }
 0x62b   : > { %v1315_v0 = vrot.slane %v1314_v46, 1  ;;  %v1331_v1 = vrot.slane %v1330_v54, 4  ;;  %v1232_v3 = vadd.f32 %v1231_v63, %v3123_v6  ;;  %2404 = vmatpush3.bf16.msra.mxu0 %v1262_v35 }
 0x62c   : > { %v1326_v4 = vmax.f32 %v1324_v43, %v1325_v56  ;;  %v1342_v47 = vmax.f32 %v1340_v44, %v1341_v58  ;;  %v1264_v48 = vpack.c.bf16 %v1240_v62, %v1237_v61  ;;  %2405 = vmatprep.subr.bf16.mxu0 %v2805_v60 }
 0x62d   : > { %v1316_v49 = vmax.f32 %v1314_v46, %v1315_v0  ;;  %v1332_v50 = vmax.f32 %v1330_v54, %v1331_v1  ;;  %v1263_v51 = vpack.c.bf16 %v1232_v3, %v1229_v2  ;;  %v1267_v0 = vld [vmem:[#allocation7 + $0x1c0] sm:$0xf] }
 0x62e   : > { %v1327_v52 = vpack.i.bf16 %v1326_v4, %v1326_v4  ;;  %v1343_v53 = vrot.slane %v1342_v47, 2  ;;  %v1358_v5 = vunpack.i.l.bf16 %v1264_v48  ;;  %v1359_v7 = vunpack.i.h.bf16 %v1264_v48  ;;  %v2611_v1 = vld [vmem:[#allocation7 + $0xc0] sm:$0xff]  }
 0x62f   : > { %v1317_v8 = vpack.i.bf16 %v1316_v49, %v1316_v49  ;;  %v1333_v9 = vrot.slane %v1332_v50, 2  ;;  %v1348_v10 = vunpack.i.l.bf16 %v1263_v51  ;;  %v1349_v11 = vunpack.i.h.bf16 %v1263_v51  ;;  %v2395_v12 = vpop.f32.mrb[44].mxu1  ;;  %2406 = vmatpush3.bf16.msra.mxu0 %v1263_v51 }
 0x630   : > { %v1462_v13 = vunpack.c.l.b16 %v1327_v52  ;;  %v1344_v14 = vmax.f32 %v1342_v47, %v1343_v53  ;;  %v1360_v15 = vmax.f32 %v1358_v5, %v1359_v7  ;;  %v1244_v17 = vpop.f32.mrb[45].mxu1  ;;  %2407 = vmatprep.subr.bf16.mxu0 %v2805_v60  ;;  %v1253_v21 = vadd.f32 %v2395_v12, %v3123_v6  ;;  %v2612_v53 = vld [vmem:[#allocation7 + $0xc8] sm:$0xff]  }
 0x631   : > { %v1461_v18 = vunpack.c.l.b16 %v1317_v8  ;;  %v1334_v19 = vmax.f32 %v1332_v50, %v1333_v9  ;;  %v1350_v20 = vmax.f32 %v1348_v10, %v1349_v11  ;;  %v2396_v59 = vpop.f32.mrb[46].mxu1  ;;  %v1245_v24 = vadd.f32 %v1244_v17, %v3123_v6 }
 0x632   : > { %v1345_v22 = vrot.slane %v1344_v14, 1  ;;  %v1361_v23 = vrot.slane %v1360_v15, 4  ;;  %v1256_v25 = vadd.f32 %v2396_v59, %v3123_v6  ;;  %v1247_v26 = vpop.f32.mrb[47].mxu1 }
 0x633   : > { %v1470_v27 = vsel %vm1469_vm1, %v1462_v13, %v1461_v18  ;;  %v1335_v28 = vrot.slane %v1334_v19, 1  ;;  %v1351_v29 = vrot.slane %v1350_v20, 4  ;;  %v1248_v30 = vadd.f32 %v1247_v26, %v3123_v6  ;;  %2408 = vmatpush3.bf16.msra.mxu0 %v1264_v48  ;;  %v2613_v13 = vld [vmem:[#allocation7 + $0xd0] sm:$0xff]   ;;  %v2616_v26 = vld [vmem:[#allocation7 + $0xe8] sm:$0xff]  }
 0x634   : > { %v1346_v31 = vmax.f32 %v1344_v14, %v1345_v22  ;;  %v1362_v32 = vmax.f32 %v1360_v15, %v1361_v23  ;;  %v1266_v34 = vpack.c.bf16 %v1256_v25, %v1253_v21  ;;  %2409 = vmatprep.subr.bf16.mxu0 %v2805_v60  ;;  %v2615_v23 = vld [vmem:[#allocation7 + $0xe0] sm:$0xff]  }
 0x635   : > { %v1336_v35 = vmax.f32 %v1334_v19, %v1335_v28  ;;  %v1352_v36 = vmax.f32 %v1350_v20, %v1351_v29  ;;  %v1265_v37 = vpack.c.bf16 %v1248_v30, %v1245_v24  ;;  %v2614_v20 = vld [vmem:[#allocation7 + $0xd8] sm:$0xff]   ;;  %v2619_v29 = vld [vmem:[#allocation7 + $0x140] sm:$0xff]   ;;  %v2620_v30 = vld [vmem:[#allocation7 + $0x148] sm:$0xff]  }
 0x636   : > { %v1347_v38 = vpack.i.bf16 %v1346_v31, %v1346_v31  ;;  %v1363_v39 = vrot.slane %v1362_v32, 2  ;;  %v1378_v40 = vunpack.i.l.bf16 %v1266_v34  ;;  %v1379_v41 = vunpack.i.h.bf16 %v1266_v34  ;;  %v2618_v28 = vld [vmem:[#allocation7 + $0xf8] sm:$0xff]   ;;  %v2621_v31 = vld [vmem:[#allocation7 + $0x150] sm:$0xff]  }
 0x637   : > { %v1337_v42 = vpack.i.bf16 %v1336_v35, %v1336_v35  ;;  %v1353_v16 = vrot.slane %v1352_v36, 2  ;;  %v1368_v33 = vunpack.i.l.bf16 %v1265_v37  ;;  %v1369_v43 = vunpack.i.h.bf16 %v1265_v37  ;;  %2410 = vmatpush3.bf16.msra.mxu0 %v1265_v37  ;;  %v2624_v35 = vld [vmem:[#allocation7 + $0x168] sm:$0xff]  }
 0x638   : > { %v1364_v6 = vmax.f32 %v1362_v32, %v1363_v39  ;;  %v1380_v44 = vmax.f32 %v1378_v40, %v1379_v41  ;;  %2411 = vmatprep.subr.bf16.mxu0 %v2805_v60  ;;  %v1464_v55 = vunpack.c.l.b16 %v1347_v38  ;;  %v2622_v32 = vld [vmem:[#allocation7 + $0x158] sm:$0xff]  }
 0x639   : > { %v1463_v45 = vunpack.c.l.b16 %v1337_v42  ;;  %v1354_v46 = vmax.f32 %v1352_v36, %v1353_v16  ;;  %v1370_v54 = vmax.f32 %v1368_v33, %v1369_v43  ;;  %v2625_v43 = vld [vmem:[#allocation7 + $0x170] sm:$0xff]  }
 0x63a   : > { %v1365_v56 = vrot.slane %v1364_v6, 1  ;;  %v1381_v58 = vrot.slane %v1380_v44, 4 }
 0x63b   : > { %v1472_v61 = vsel %vm1471_vm2, %v1463_v45, %v1470_v27  ;;  %v1355_v62 = vrot.slane %v1354_v46, 1  ;;  %v1371_v63 = vrot.slane %v1370_v54, 4  ;;  %2412 = vmatpush3.bf16.msra.mxu0 %v1266_v34  ;;  %v2617_v27 = vld [vmem:[#allocation7 + $0xf0] sm:$0xff]   ;;  %v2623_v34 = vld [vmem:[#allocation7 + $0x160] sm:$0xff]   ;;  %v2628_v45 = vld [vmem:[#allocation7 + $0x188] sm:$0xff]  }
 0x63c   : > { %v1366_v2 = vmax.f32 %v1364_v6, %v1365_v56  ;;  %v1382_v3 = vmax.f32 %v1380_v44, %v1381_v58  ;;  %v1474_v4 = vsel %vm1473_vm3, %v1464_v55, %v1472_v61  ;;  %2437 = vmatprep.subr.bf16.mxu0 %v2805_v60  ;;  %v2626_v6 = vld [vmem:[#allocation7 + $0x178] sm:$0xff]   ;;  %v2627_v44 = vld [vmem:[#allocation7 + $0x180] sm:$0xff]   ;;  %v2632_v56 = vld [vmem:[#allocation7 + $0x1a8] sm:$0xff]   ;;  %v1663_v58 = vsub.s32 3, %v3081_v57 }
 0x63d   : > { %v1356_v47 = vmax.f32 %v1354_v46, %v1355_v62  ;;  %v1372_v48 = vmax.f32 %v1370_v54, %v1371_v63  ;;  %v2629_v46 = vld [vmem:[#allocation7 + $0x190] sm:$0xff]   ;;  %v2630_v54 = vld [vmem:[#allocation7 + $0x198] sm:$0xff]   ;;  %v2631_v55 = vld [vmem:[#allocation7 + $0x1a0] sm:$0xff]  }
 0x63e   : > { %v1367_v49 = vpack.i.bf16 %v1366_v2, %v1366_v2  ;;  %v1383_v50 = vrot.slane %v1382_v3, 2  ;;  %2414 = vmatmul.mubr.bf16.vlgmr.msra.gmra.mrb[48].mxu0 %v1267_v0  ;;  %v2635_v61 = vld [vmem:[%s3235_s3] sm:$0xff] }
 0x63f   : > { %v1357_v51 = vpack.i.bf16 %v1356_v47, %v1356_v47  ;;  %v1373_v52 = vrot.slane %v1372_v48, 2  ;;  %2438 = vmatpush3.bf16.msra.mxu0 %v2611_v1  ;;  %2453 = vmatprep.mubr.msk.bf16.mxu0 %vm2806_vm0, %v2805_v60  ;;  %v1664_v62 = vrot.slane %v2635_v61, %v1663_v58 }
 0x640   : > { %v1384_v5 = vmax.f32 %v1382_v3, %v1383_v50  ;;  %2439 = vmatprep.subr.bf16.mxu0 %v2805_v60  ;;  %v1466_v9 = vunpack.c.l.b16 %v1367_v49  ;;  %v2633_v49 = vld [vmem:[#allocation7 + $0x1b0] sm:$0xff]   ;;  %v2634_v50 = vld [vmem:[#allocation7 + $0x1b8] sm:$0xff]  }
 0x641   : > { %v1465_v7 = vunpack.c.l.b16 %v1357_v51  ;;  %v1374_v8 = vmax.f32 %v1372_v48, %v1373_v52  ;;  %v1670_v51 = vsub.s32 4, %v3081_v57 }
 0x642   : > { %v1385_v10 = vrot.slane %v1384_v5, 1 }
 0x643   : > { %v1375_v11 = vrot.slane %v1374_v8, 1  ;;  %v1476_v12 = vsel %vm1475_vm4, %v1465_v7, %v1474_v4  ;;  %2440 = vmatpush3.bf16.msra.mxu0 %v2612_v53  ;;  %v1671_v52 = vrot.slane %v2635_v61, %v1670_v51 }
 0x644   : > { %v1386_v14 = vmax.f32 %v1384_v5, %v1385_v10  ;;  %v1478_v15 = vsel %vm1477_vm5, %v1466_v9, %v1476_v12  ;;  %2441 = vmatprep.subr.bf16.mxu0 %v2805_v60  ;;  %v1764_v12 = vsub.s32 5, %v3081_v57 }
 0x645   : > { %v1376_v17 = vmax.f32 %v1374_v8, %v1375_v11 }
 0x646   : > { %v1387_v18 = vpack.i.bf16 %v1386_v14, %v1386_v14 }
 0x647   : > { %v1377_v19 = vpack.i.bf16 %v1376_v17, %v1376_v17  ;;  %2442 = vmatpush3.bf16.msra.mxu0 %v2613_v13 }
 0x648   : > { %2443 = vmatprep.subr.bf16.mxu0 %v2805_v60  ;;  %v1468_v59 = vunpack.c.l.b16 %v1387_v18 }
 0x649   : > { %v1467_v21 = vunpack.c.l.b16 %v1377_v19 }
 0x64b   : > { %v1480_v22 = vsel %vm1479_vm6, %v1467_v21, %v1478_v15  ;;  %2444 = vmatpush3.bf16.msra.mxu0 %v2614_v20 }
 0x64c   : > { %v1482_v24 = vsel %vm1481_vm7, %v1468_v59, %v1480_v22  ;;  %2445 = vmatprep.subr.bf16.mxu0 %v2805_v60 }
 0x64d   : > { %v1483_v25 = vpack.c.b16 %v1482_v24, %v1482_v24 }
 0x64f   : > { %2434 = vmatmul.mubr.bf16.vlgmr.msra.gmra.mrb[48].mxu1 %v1483_v25  ;;  %2446 = vmatpush3.bf16.msra.mxu0 %v2615_v23 }
 0x650   : > { %2447 = vmatprep.subr.bf16.mxu0 %v2805_v60  ;;  %2473 = vmatprep.mubr.msk.bf16.mxu1 %vm2806_vm0, %v2805_v60 }
 0x651   : > { %2458 = vmatpush3.bf16.msra.mxu1 %v2619_v29 }
 0x652   : > { %2459 = vmatprep.subr.bf16.mxu1 %v2805_v60 }
 0x653   : > { %2448 = vmatpush3.bf16.msra.mxu0 %v2616_v26 }
 0x654   : > { %2449 = vmatprep.subr.bf16.mxu0 %v2805_v60 }
 0x655   : > { %2460 = vmatpush3.bf16.msra.mxu1 %v2620_v30 }
 0x656   : > { %2461 = vmatprep.subr.bf16.mxu1 %v2805_v60 }
 0x657   : > { %2450 = vmatpush3.bf16.msra.mxu0 %v2617_v27 }
 0x658   : > { %2451 = vmatprep.subr.bf16.mxu0 %v2805_v60 }
 0x659   : > { %2462 = vmatpush3.bf16.msra.mxu1 %v2621_v31 }
 0x65a   : > { %2463 = vmatprep.subr.bf16.mxu1 %v2805_v60 }
 0x65b   : > { %2452 = vmatpush3.bf16.msra.mxu0 %v2618_v28 }
 0x65c   : > { %2477 = vmatprep.subr.bf16.mxu0 %v2805_v60 }
 0x65d   : > { %2464 = vmatpush3.bf16.msra.mxu1 %v2622_v32 }
 0x65e   : > { %2465 = vmatprep.subr.bf16.mxu1 %v2805_v60 }
 0x661   : > { %2466 = vmatpush3.bf16.msra.mxu1 %v2623_v34 }
 0x662   : > { %2467 = vmatprep.subr.bf16.mxu1 %v2805_v60 }
 0x665   : > { %2468 = vmatpush3.bf16.msra.mxu1 %v2624_v35 }
 0x666   : > { %2469 = vmatprep.subr.bf16.mxu1 %v2805_v60 }
 0x669   : > { %2470 = vmatpush3.bf16.msra.mxu1 %v2625_v43 }
 0x66a   : > { %2471 = vmatprep.subr.bf16.mxu1 %v2805_v60 }
 0x66d   : > { %2472 = vmatpush3.bf16.msra.mxu1 %v2626_v6 }
 0x711   : > { %v1302_v36 = vpop.f32.mrb[48].mxu0 }
 0x712   : > { %v1452_v37 = vpack.c.bf16 %v1302_v36, %v1302_v36  ;;  %v2415_v38 = vpop.f32.mrb[49].mxu0 }
 0x713   : > { %v1305_v39 = vpop.f32.mrb[50].mxu0 }
 0x714   : > { %v2416_v40 = vpop.f32.mrb[51].mxu0  ;;  %2454 = vmatmul.mubr.bf16.vlgmr.msra.gmra.mrb[52].mxu0 %v1452_v37 }
 0x715   : > { %2493 = vmatprep.mubr.msk.bf16.mxu0 %vm2806_vm0, %v2805_v60  ;;  %2478 = vmatpush3.bf16.msra.mxu0 %v2627_v44 }
 0x716   : > { %2479 = vmatprep.subr.bf16.mxu0 %v2805_v60 }
 0x719   : > { %2480 = vmatpush3.bf16.msra.mxu0 %v2628_v45 }
 0x71a   : > { %2481 = vmatprep.subr.bf16.mxu0 %v2805_v60 }
 0x71d   : > { %2482 = vmatpush3.bf16.msra.mxu0 %v2629_v46 }
 0x71e   : > { %2483 = vmatprep.subr.bf16.mxu0 %v2805_v60 }
 0x721   : > { %2484 = vmatpush3.bf16.msra.mxu0 %v2630_v54 }
 0x722   : > { %v1567_v41 = vpop.f32.mrb[48].mxu1  ;;  %2485 = vmatprep.subr.bf16.mxu0 %v2805_v60 }
 0x723   : > { %v2435_v42 = vpop.f32.mrb[49].mxu1 }
 0x724   : > { %v1570_v16 = vpop.f32.mrb[50].mxu1 }
 0x725   : > { %v2436_v33 = vpop.f32.mrb[51].mxu1  ;;  %2486 = vmatpush3.bf16.msra.mxu0 %v2631_v55 }
 0x726   : > { %2487 = vmatprep.subr.bf16.mxu0 %v2805_v60 }
 0x729   : > { %2488 = vmatpush3.bf16.msra.mxu0 %v2632_v56 }
 0x72a   : > { %2489 = vmatprep.subr.bf16.mxu0 %v2805_v60 }
 0x72d   : > { %2490 = vmatpush3.bf16.msra.mxu0 %v2633_v49 }
 0x72e   : > { %2491 = vmatprep.subr.bf16.mxu0 %v2805_v60  ;;  %v1765_v60 = vrot.slane %v2635_v61, %v1764_v12 }
 0x731   : > { %2492 = vmatpush3.bf16.msra.mxu0 %v2634_v50 }
 0x7e7   : > { %v1655_v63 = vpop.f32.mrb[52].mxu0 }
 0x7e8   : > { %v1656_v0 = vadd.f32 %v1655_v63, %v1567_v41  ;;  %v2455_v1 = vpop.f32.mrb[53].mxu0 }
 0x7e9   : > { %v1658_v2 = vpop.f32.mrb[54].mxu0 }
 0x7ea   : > { %v1665_v3 = vadd.f32 %v1664_v62, %v1656_v0  ;;  %v2456_v4 = vpop.f32.mrb[55].mxu0 }
 0x7ec   : > { %v1666_v47 = vmax.f32 %v1665_v3, 0.0 }
 0x7ee   : > { %v1667_v48 = vpack.c.bf16 %v1666_v47, %v1666_v47 }
 0x7f0   : > { %2474 = vmatmul.mubr.bf16.vlgmr.msra.gmra.mrb[52].mxu1 %v1667_v48 }
 0x8c3   : > { %v1754_v53 = vpop.f32.mrb[52].mxu1 }
 0x8c4   : > { %v1755_v5 = vadd.f32 %v1754_v53, %v1671_v52  ;;  %v2475_v7 = vpop.f32.mrb[53].mxu1 }
 0x8c5   : > { %v1757_v8 = vpop.f32.mrb[54].mxu1 }
 0x8c6   : > { %v1760_v9 = vmax.f32 %v1755_v5, 0.0  ;;  %v2476_v10 = vpop.f32.mrb[55].mxu1 }
 0x8c8   : > { %v1761_v11 = vpack.c.bf16 %v1760_v9, %v1760_v9 }
 0x8ca   : > { %2494 = vmatmul.mubr.bf16.vlgmr.msra.gmra.mrb[56].mxu0 %v1761_v11 }
 0x99d   : > { %v1848_v13 = vpop.f32.mrb[56].mxu0 }
 0x99e   : > { %v1849_v14 = vadd.f32 %v1848_v13, %v1765_v60  ;;  %v2495_v15 = vpop.f32.mrb[57].mxu0 }
 0x99f   : > { %v1851_v17 = vpop.f32.mrb[58].mxu0 }
 0x9a0   : > { %1854 = vst [vmem:[%s269_s5] sm:$0xff] %v1849_v14  ;;  %v2496_v57 = vpop.f32.mrb[59].mxu0 }
 0x9a1   : > { %2737 = shalt.err (!%p2734_p6)
}
 0x9a2   : > { %s2738_s24 = scalar_lea.hbm %s3188_s25, 128  ;;  %s2742_s23 = scalar_lea.hbm %s3236_s4, 256 }
 0x9a3   : > { %p2739_p8 = scmp.ne.s32.totalorder %s3188_s25, %s2738_s24  ;;  %p2743_p4 = scmp.lt.u32.totalorder %s3188_s25, %s3236_s4 }
 0x9a4   : > { %p2744_p11 = scmp.lt.u32.totalorder %s2742_s23, %s2738_s24  ;;  %p2746_p3 = scmp.lt.u32.totalorder %s2738_s24, %s3188_s25 }
 0x9a5   : > { %p2740_p10 = pnand %p2739_p8, %p2927_p12 }
 0x9a6   : > { %p2745_p13 = por %p2744_p11, %p2743_p4 }
 0x9a7   : > { %p2741_p0 = pneg %p2740_p10 }
 0x9a8   : > { %p2747_p7 = por %p2746_p3, %p2745_p13 }
 0x9aa   : > { %p2748_p9 = pnand %p2747_p7, %p2741_p0 }
 0x9ac   : > { %2751 = shalt.err (!%p2748_p9)
}
 0x9ad   : > { %2505 = dma.vmem_to_hbm [thread:$0]  (%p2927_p12), %s3190_s10, 128, %s3188_s25, %s1856_s29  }
 0x9ae PF: > { %s1881_s12 = sand.u32 1, %s2786_s15   ;;  %p3262_p1 = scmp.ne.s32.totalorder %s3247_s22, 0 }
 0x9af   : > { %p3263_p5 = scmp.ge.s32.totalorder %s2798_s18, 2  ;;  %s1882_s13 = scalar_lea.sflag [#allocation4], %s1881_s12 }
 0x9b1   : > { %p2519_p2 = pnand %p3263_p5, %p3262_p1 }
 0x9b3   : > { %2781 = dma.done.wait (!%p2519_p2), %s1882_s13, 128  }
 0x9b4   : > { %2783 = vsyncadd (!%p2519_p2), %s1882_s13, 4294967168  ;;  %s3264_s7 = sld [smem:[#allocation13_spill]]  ;;  %p20_p6 = scmp.ge.s32.totalorder %s2889_s27, 4  }
 0x9b5   : > { %s3265_s15 = smov %s2790_s16  ;;  %s3266_s16 = smov %s2794_s17 }
 0x9b6   : > { %s3268_s18 = smov %s2889_s27  ;;  %22 = sbr.rel (!%p20_p6) target bundleno = 10 (0xa), region = 98 }
 0x9ba   : > { %s3267_s17 = smov %s3264_s7 }
 0x9bd   :  { %1887 = vsyncpa [#allocation3], 1 }
 0x9be   :  { %1889 = vsyncpa [#allocation3 + $0x1], 1 }
 0x9bf   :  { %1890 = vsyncpa [#allocation6], 1 }
 0x9c0   :  { %1892 = vsyncpa [#allocation6 + $0x1], 1 }
 0x9c1   :  { %1893 = vsyncpa [#allocation4], 1 }
 0x9c2   :  { %1895 = vsyncpa [#allocation4 + $0x1], 1 }

</bundles_post_ra>
